<compile_context>
chip_gen: v7x
topology: tpu7x:2x2x1
jax: 0.10.0
libtpu: 0.0.40
codegen_flags: <defaults>
</compile_context>

<pallas_src>
import functools

import jax
import jax.numpy as jnp
from jax import lax
from jax.experimental import pallas as pl
from jax.experimental.pallas import tpu as pltpu


def _attn_adain_kernel(ck_ref, g_ref, hs2_ref, ct_ref, cmean_ref, cinvstd_ref,
                       wf_ref, bf_ref, out_ref, *, cin, mxu_dtype):
    # One (batch, Nc-tile) pair per grid step.
    ck = ck_ref[0]         # (tq, Ck)      content-key tokens (this q tile)
    G = g_ref[0]           # (Ns, Ck)      projected style keys (per batch)
    Hs2 = hs2_ref[0]       # (Ns, 2*Cin)   [Hs | Hs*Hs] (per batch)
    ct = ct_ref[0]         # (tq, Cin)     content tokens (this q tile)

    # f 1x1-conv fused per tile (weights pre-transposed to (Ck, Ck)).
    F = jnp.dot(ck.astype(mxu_dtype), wf_ref[...].astype(mxu_dtype),
                preferred_element_type=jnp.float32) + bf_ref[...]

    # Scores S = F @ G^T without materializing a transpose of G:
    # contract the last (channel) dims of both operands.
    S = lax.dot_general(F.astype(mxu_dtype), G.astype(mxu_dtype),
                        dimension_numbers=(((1,), (1,)), ((), ())),
                        preferred_element_type=jnp.float32)        # (tq, Ns)

    # Softmax over style tokens (VPU math stays f32; divide -> EUP reciprocal).
    S = S - jnp.max(S, axis=-1, keepdims=True)
    E = jnp.exp(S)
    P = E * pl.reciprocal(jnp.sum(E, axis=-1, keepdims=True), approx=True)

    # One fused MXU pass over P gives [mean | E[x^2]].
    M = jnp.dot(P.astype(mxu_dtype), Hs2.astype(mxu_dtype),
                preferred_element_type=jnp.float32)                # (tq, 2*Cin)
    mean = M[:, :cin]
    sq = M[:, cin:]
    std = jnp.sqrt(jnp.maximum(sq - mean * mean, 0.0))

    # mean_variance_norm(content): per-(batch, channel) stats precomputed in
    # the wrapper; here it is a cheap per-tile affine.
    norm = (ct - cmean_ref[0]) * cinvstd_ref[0]

    # Channel-major write: lane axis = token axis (128-aligned at real sizes).
    out_ref[0] = (std * norm + mean).T.astype(out_ref.dtype)


def attn_adain(content, style, content_key, style_key, params,
               *, tq=None, mxu_dtype=jnp.float32):
    """content/style/..._key are NCHW float32 arrays (PyTorch convention)."""
    b, cin, h, w = content.shape
    _, ckp, hg, wg = style_key.shape
    nc = h * w
    ns = hg * wg

    def tok(x):  # NCHW -> (B, N, C): tokens on sublanes, channels on lanes
        bb, cc, hh, ww = x.shape
        return jnp.transpose(x.reshape(bb, cc, hh * ww), (0, 2, 1))

    wf, bf, wg_w, bg, wh, bh = params  # weights pre-transposed to (Cin, Cout)

    ck_t = tok(content_key)                          # (b, Nc, Ck)
    ct_t = tok(content)                              # (b, Nc, Cin)

    # Style-side projections (g, h 1x1 convs) once per batch via XLA; doing
    # them per Nc tile inside the kernel would duplicate O(Ns*C^2) work.
    G = (tok(style_key) @ wg_w + bg).astype(mxu_dtype)       # (b, Ns, Ck)
    Hs = tok(style) @ wh + bh                                # (b, Ns, Cin)
    Hs2 = jnp.concatenate([Hs, Hs * Hs], axis=-1).astype(mxu_dtype)

    # Content instance-norm stats hoisted out of the kernel (unbiased var,
    # matching torch .var(dim=2)).
    c_mean = jnp.mean(ct_t, axis=1, keepdims=True)           # (b, 1, Cin)
    c_inv_std = lax.rsqrt(jnp.var(ct_t, axis=1, keepdims=True, ddof=1) + 1e-5)

    # Pick a query tile: 128-aligned (MXU/lane friendly) and dividing Nc,
    # otherwise fall back to the full Nc block.
    if tq is None or nc % tq or (tq % 128 and tq != nc):
        if nc % 256 == 0:
            tq = 256
        elif nc % 128 == 0:
            tq = 128
        else:
            tq = nc
    nq = nc // tq

    kernel = functools.partial(_attn_adain_kernel, cin=cin, mxu_dtype=mxu_dtype)

    out_cm = pl.pallas_call(
        kernel,
        out_shape=jax.ShapeDtypeStruct((b, cin, nc), jnp.float32),
        grid_spec=pltpu.PrefetchScalarGridSpec(
            num_scalar_prefetch=0,
            grid=(b, nq),
            in_specs=[
                pl.BlockSpec((1, tq, ckp), lambda ib, iq: (ib, iq, 0)),      # ck tile
                pl.BlockSpec((1, ns, ckp), lambda ib, iq: (ib, 0, 0)),       # G (per batch)
                pl.BlockSpec((1, ns, 2 * cin), lambda ib, iq: (ib, 0, 0)),   # Hs2 (per batch)
                pl.BlockSpec((1, tq, cin), lambda ib, iq: (ib, iq, 0)),      # ct tile
                pl.BlockSpec((1, 1, cin), lambda ib, iq: (ib, 0, 0)),        # c_mean
                pl.BlockSpec((1, 1, cin), lambda ib, iq: (ib, 0, 0)),        # c_inv_std
                pl.BlockSpec((ckp, ckp), lambda ib, iq: (0, 0)),             # wf
                pl.BlockSpec((1, ckp), lambda ib, iq: (0, 0)),               # bf
            ],
            out_specs=pl.BlockSpec((1, cin, tq), lambda ib, iq: (ib, 0, iq)),
        ),
        compiler_params=pltpu.CompilerParams(
            dimension_semantics=("parallel", "parallel"),
            # Explicit scoped-VMEM budget: raises v5e's 16 MiB default while
            # staying under v7x's 64 MiB physical VMEM per TensorCore.
            vmem_limit_bytes=48 * 1024 * 1024),
    )(ck_t, G, Hs2, ct_t, c_mean, c_inv_std, wf, bf.reshape(1, -1))

    # (b, Cin, Nc) is already channel-major: reshape to NCHW is free.
    return out_cm.reshape(b, cin, h, w)


def _reference(content, style, content_key, style_key, params):
    """Pure-JAX reference mirroring the PyTorch forward (no masks)."""
    wf, bf, wg_w, bg, wh, bh = params
    b, cin, h, w = content.shape

    def tok(x):
        bb, cc, hh, ww = x.shape
        return jnp.transpose(x.reshape(bb, cc, hh * ww), (0, 2, 1))

    F = tok(content_key) @ wf + bf            # (b, Nc, Ck)
    G = tok(style_key) @ wg_w + bg            # (b, Ns, Ck)
    Hs = tok(style) @ wh + bh                 # (b, Ns, Cin)

    S = jax.nn.softmax(jnp.einsum("bnk,bmk->bnm", F, G), axis=-1)
    mean = jnp.einsum("bnm,bmc->bnc", S, Hs)
    std = jnp.sqrt(jnp.maximum(jnp.einsum("bnm,bmc->bnc", S, Hs * Hs) - mean ** 2, 0.0))

    ct = tok(content)                          # (b, Nc, Cin)
    c_mean = jnp.mean(ct, axis=1, keepdims=True)
    c_var = jnp.var(ct, axis=1, keepdims=True, ddof=1) + 1e-5
    norm = (ct - c_mean) / jnp.sqrt(c_var)

    out = std * norm + mean
    return jnp.transpose(out, (0, 2, 1)).reshape(b, cin, h, w)


def _init_params(key, in_planes, key_planes):
    """Deterministic Conv2d-style init: uniform(-1/sqrt(fan_in), 1/sqrt(fan_in))."""
    ks = jax.random.split(key, 6)

    def lin(kw, kb, cin, cout):
        bound = 1.0 / (cin ** 0.5)
        # weight stored pre-transposed: (Cin, Cout) so kernel does x @ W
        wgt = jax.random.uniform(kw, (cin, cout), jnp.float32, -bound, bound)
        bias = jax.random.uniform(kb, (cout,), jnp.float32, -bound, bound)
        return wgt, bias

    wf, bf = lin(ks[0], ks[1], key_planes, key_planes)
    wg, bg = lin(ks[2], ks[3], key_planes, key_planes)
    wh, bh = lin(ks[4], ks[5], in_planes, in_planes)
    return (wf, bf, wg, bg, wh, bh)


if __name__ == "__main__":
    key = jax.random.PRNGKey(0)
    b, in_planes, key_planes = 2, 4, 4
    h = w = 16         # content spatial  -> Nc = 256 (exercises Nc tiling)
    hs = ws = 8        # style spatial    -> Ns = 64

    k1, k2, k3, k4, kp = jax.random.split(key, 5)
    content = jax.random.normal(k1, (b, in_planes, h, w), jnp.float32)
    style = jax.random.normal(k2, (b, in_planes, hs, ws), jnp.float32)
    content_key = jax.random.normal(k3, (b, key_planes, h, w), jnp.float32)
    style_key = jax.random.normal(k4, (b, key_planes, hs, ws), jnp.float32)

    params = _init_params(kp, in_planes, key_planes)

    # Exact (f32 MXU) path, with the Nc axis split into two 128-token tiles.
    out = attn_adain(content, style, content_key, style_key, params, tq=128)
    out = jax.block_until_ready(out)

    ref = _reference(content, style, content_key, style_key, params)
    assert out.shape == (b, in_planes, h, w)
    assert jnp.allclose(out, ref, rtol=1e-2, atol=1e-2), (
        float(jnp.max(jnp.abs(out - ref))))

    # bf16-fed MXU path (recommended on v6e/v7x): smoke-test compile & run.
    out_bf16 = attn_adain(content, style, content_key, style_key, params,
                          tq=128, mxu_dtype=jnp.bfloat16)
    out_bf16 = jax.block_until_ready(out_bf16)
    assert out_bf16.shape == (b, in_planes, h, w)
    assert bool(jnp.all(jnp.isfinite(out_bf16)))

    print("KERNEL_OK")
</pallas_src>

<mosaic_0001>
module attributes {stable_mosaic.version = 11 : i64} {
  func.func @_attn_adain_kernel(%arg0: i32, %arg1: i32, %arg2: memref<1x128x4xf32, #tpu.memory_space<vmem>>, %arg3: memref<1x64x4xf32, #tpu.memory_space<vmem>>, %arg4: memref<1x64x8xf32, #tpu.memory_space<vmem>>, %arg5: memref<1x128x4xf32, #tpu.memory_space<vmem>>, %arg6: memref<1x1x4xf32, #tpu.memory_space<vmem>>, %arg7: memref<1x1x4xf32, #tpu.memory_space<vmem>>, %arg8: memref<4x4xf32, #tpu.memory_space<vmem>>, %arg9: memref<1x4xf32, #tpu.memory_space<vmem>>, %arg10: memref<1x4x128xf32, #tpu.memory_space<vmem>>) attributes {dimension_semantics = [#tpu.dimension_semantics<parallel>, #tpu.dimension_semantics<parallel>], iteration_bounds = array<i64: 2, 2>, scalar_prefetch = 0 : i64, scratch_operands = 0 : i64, tpu.core_type = #tpu.core_type<tc>, window_params = [{transform_indices = @transform_0, window_bounds = array<i64: 1, 128, 4>}, {transform_indices = @transform_1, window_bounds = array<i64: 1, 64, 4>}, {transform_indices = @transform_2, window_bounds = array<i64: 1, 64, 8>}, {transform_indices = @transform_3, window_bounds = array<i64: 1, 128, 4>}, {transform_indices = @transform_4, window_bounds = array<i64: 1, 1, 4>}, {transform_indices = @transform_5, window_bounds = array<i64: 1, 1, 4>}, {pipeline_mode = #tpu.pipeline_mode<synchronous>, transform_indices = @transform_6, window_bounds = array<i64: 4, 4>}, {pipeline_mode = #tpu.pipeline_mode<synchronous>, transform_indices = @transform_7, window_bounds = array<i64: 1, 4>}, {transform_indices = @transform_8, window_bounds = array<i64: 1, 4, 128>}]} {
    %c0 = arith.constant 0 : index
    %c0_0 = arith.constant 0 : index
    %c0_1 = arith.constant 0 : index
    %0 = vector.load %arg2[%c0, %c0_0, %c0_1] : memref<1x128x4xf32, #tpu.memory_space<vmem>>, vector<1x128x4xf32>
    %1 = vector.shape_cast %0 : vector<1x128x4xf32> to vector<128x4xf32>
    %c0_2 = arith.constant 0 : index
    %c0_3 = arith.constant 0 : index
    %c0_4 = arith.constant 0 : index
    %2 = vector.load %arg3[%c0_2, %c0_3, %c0_4] : memref<1x64x4xf32, #tpu.memory_space<vmem>>, vector<1x64x4xf32>
    %3 = vector.shape_cast %2 : vector<1x64x4xf32> to vector<64x4xf32>
    %c0_5 = arith.constant 0 : index
    %c0_6 = arith.constant 0 : index
    %c0_7 = arith.constant 0 : index
    %4 = vector.load %arg4[%c0_5, %c0_6, %c0_7] : memref<1x64x8xf32, #tpu.memory_space<vmem>>, vector<1x64x8xf32>
    %5 = vector.shape_cast %4 : vector<1x64x8xf32> to vector<64x8xf32>
    %c0_8 = arith.constant 0 : index
    %c0_9 = arith.constant 0 : index
    %c0_10 = arith.constant 0 : index
    %6 = vector.load %arg5[%c0_8, %c0_9, %c0_10] : memref<1x128x4xf32, #tpu.memory_space<vmem>>, vector<1x128x4xf32>
    %7 = vector.shape_cast %6 : vector<1x128x4xf32> to vector<128x4xf32>
    %c0_11 = arith.constant 0 : index
    %c0_12 = arith.constant 0 : index
    %8 = vector.load %arg8[%c0_11, %c0_12] : memref<4x4xf32, #tpu.memory_space<vmem>>, vector<4x4xf32>
    %cst = arith.constant dense<0.000000e+00> : vector<128x4xf32>
    %9 = tpu.matmul %1, %8, %cst {dimension_numbers = #tpu.dot_dimension_numbers<[1], [0], [0], [1], [0, 0, 1, 1], [], []>} : vector<128x4xf32>, vector<4x4xf32>, vector<128x4xf32> -> vector<128x4xf32>
    %c0_13 = arith.constant 0 : index
    %c0_14 = arith.constant 0 : index
    %10 = vector.load %arg9[%c0_13, %c0_14] : memref<1x4xf32, #tpu.memory_space<vmem>>, vector<1x4xf32>
    %11 = vector.broadcast %10 : vector<1x4xf32> to vector<128x4xf32>
    %12 = arith.addf %9, %11 : vector<128x4xf32>
    %cst_15 = arith.constant dense<0.000000e+00> : vector<128x64xf32>
    %13 = tpu.matmul %12, %3, %cst_15 {dimension_numbers = #tpu.dot_dimension_numbers<[1], [1], [0], [0], [0, 0, 1, 0], [], []>} : vector<128x4xf32>, vector<64x4xf32>, vector<128x64xf32> -> vector<128x64xf32>
    %cst_16 = arith.constant dense<0xFF800000> : vector<128xf32>
    %14 = vector.multi_reduction <maximumf>, %13, %cst_16 [1] : vector<128x64xf32> to vector<128xf32>
    %15 = vector.shape_cast %14 : vector<128xf32> to vector<128x1xf32>
    %16 = vector.broadcast %15 : vector<128x1xf32> to vector<128x64xf32>
    %17 = arith.subf %13, %16 : vector<128x64xf32>
    %18 = math.exp %17 : vector<128x64xf32>
    %cst_17 = arith.constant dense<0.000000e+00> : vector<128xf32>
    %19 = vector.multi_reduction <add>, %18, %cst_17 [1] : vector<128x64xf32> to vector<128xf32>
    %20 = vector.shape_cast %19 : vector<128xf32> to vector<128x1xf32>
    %21 = tpu.reciprocal %20 {approx = true} : vector<128x1xf32> -> vector<128x1xf32>
    %22 = vector.broadcast %21 : vector<128x1xf32> to vector<128x64xf32>
    %23 = arith.mulf %18, %22 : vector<128x64xf32>
    %cst_18 = arith.constant dense<0.000000e+00> : vector<128x8xf32>
    %24 = tpu.matmul %23, %5, %cst_18 {dimension_numbers = #tpu.dot_dimension_numbers<[1], [0], [0], [1], [0, 0, 1, 1], [], []>} : vector<128x64xf32>, vector<64x8xf32>, vector<128x8xf32> -> vector<128x8xf32>
    %25 = vector.extract_strided_slice %24 {offsets = [0, 0], sizes = [128, 4], strides = [1, 1]} : vector<128x8xf32> to vector<128x4xf32>
    %26 = vector.extract_strided_slice %24 {offsets = [0, 4], sizes = [128, 4], strides = [1, 1]} : vector<128x8xf32> to vector<128x4xf32>
    %27 = arith.mulf %25, %25 : vector<128x4xf32>
    %28 = arith.subf %26, %27 : vector<128x4xf32>
    %cst_19 = arith.constant 0.000000e+00 : f32
    %29 = vector.broadcast %cst_19 : f32 to vector<128x4xf32>
    %30 = arith.maximumf %28, %29 : vector<128x4xf32>
    %31 = math.sqrt %30 : vector<128x4xf32>
    %c0_20 = arith.constant 0 : index
    %c0_21 = arith.constant 0 : index
    %c0_22 = arith.constant 0 : index
    %32 = vector.load %arg6[%c0_20, %c0_21, %c0_22] : memref<1x1x4xf32, #tpu.memory_space<vmem>>, vector<1x1x4xf32>
    %33 = vector.shape_cast %32 : vector<1x1x4xf32> to vector<1x4xf32>
    %34 = vector.broadcast %33 : vector<1x4xf32> to vector<128x4xf32>
    %35 = arith.subf %7, %34 : vector<128x4xf32>
    %c0_23 = arith.constant 0 : index
    %c0_24 = arith.constant 0 : index
    %c0_25 = arith.constant 0 : index
    %36 = vector.load %arg7[%c0_23, %c0_24, %c0_25] : memref<1x1x4xf32, #tpu.memory_space<vmem>>, vector<1x1x4xf32>
    %37 = vector.shape_cast %36 : vector<1x1x4xf32> to vector<1x4xf32>
    %38 = vector.broadcast %37 : vector<1x4xf32> to vector<128x4xf32>
    %39 = arith.mulf %35, %38 : vector<128x4xf32>
    %40 = arith.mulf %31, %39 : vector<128x4xf32>
    %41 = arith.addf %40, %25 : vector<128x4xf32>
    %42 = tpu.transpose %41, [1, 0] : vector<128x4xf32> -> vector<4x128xf32>
    %c0_26 = arith.constant 0 : index
    %c0_27 = arith.constant 0 : index
    %c0_28 = arith.constant 0 : index
    %43 = vector.load %arg10[%c0_26, %c0_27, %c0_28] : memref<1x4x128xf32, #tpu.memory_space<vmem>>, vector<1x4x128xf32>
    %44 = vector.shape_cast %43 : vector<1x4x128xf32> to vector<4x128xf32>
    %45 = vector.shape_cast %42 : vector<4x128xf32> to vector<1x4x128xf32>
    tpu.vector_store %arg10[%c0_26, %c0_27, %c0_28], %45 {strides = array<i32>} : memref<1x4x128xf32, #tpu.memory_space<vmem>>, vector<1x4x128xf32>,
    return
  }
  func.func @transform_0(%arg0: i32, %arg1: i32) -> (i32, i32, i32) {
    %c0_i32 = arith.constant 0 : i32
    %c0_i32_0 = arith.constant 0 : i32
    return %arg0, %arg1, %c0_i32 : i32, i32, i32
  }
  func.func @transform_1(%arg0: i32, %arg1: i32) -> (i32, i32, i32) {
    %c0_i32 = arith.constant 0 : i32
    %c0_i32_0 = arith.constant 0 : i32
    %c0_i32_1 = arith.constant 0 : i32
    return %arg0, %c0_i32, %c0_i32_0 : i32, i32, i32
  }
  func.func @transform_2(%arg0: i32, %arg1: i32) -> (i32, i32, i32) {
    %c0_i32 = arith.constant 0 : i32
    %c0_i32_0 = arith.constant 0 : i32
    %c0_i32_1 = arith.constant 0 : i32
    return %arg0, %c0_i32, %c0_i32_0 : i32, i32, i32
  }
  func.func @transform_3(%arg0: i32, %arg1: i32) -> (i32, i32, i32) {
    %c0_i32 = arith.constant 0 : i32
    %c0_i32_0 = arith.constant 0 : i32
    return %arg0, %arg1, %c0_i32 : i32, i32, i32
  }
  func.func @transform_4(%arg0: i32, %arg1: i32) -> (i32, i32, i32) {
    %c0_i32 = arith.constant 0 : i32
    %c0_i32_0 = arith.constant 0 : i32
    %c0_i32_1 = arith.constant 0 : i32
    return %arg0, %c0_i32, %c0_i32_0 : i32, i32, i32
  }
  func.func @transform_5(%arg0: i32, %arg1: i32) -> (i32, i32, i32) {
    %c0_i32 = arith.constant 0 : i32
    %c0_i32_0 = arith.constant 0 : i32
    %c0_i32_1 = arith.constant 0 : i32
    return %arg0, %c0_i32, %c0_i32_0 : i32, i32, i32
  }
  func.func @transform_6(%arg0: i32, %arg1: i32) -> (i32, i32) {
    %c0_i32 = arith.constant 0 : i32
    %c0_i32_0 = arith.constant 0 : i32
    %c0_i32_1 = arith.constant 0 : i32
    return %c0_i32, %c0_i32_0 : i32, i32
  }
  func.func @transform_7(%arg0: i32, %arg1: i32) -> (i32, i32) {
    %c0_i32 = arith.constant 0 : i32
    %c0_i32_0 = arith.constant 0 : i32
    %c0_i32_1 = arith.constant 0 : i32
    return %c0_i32, %c0_i32_0 : i32, i32
  }
  func.func @transform_8(%arg0: i32, %arg1: i32) -> (i32, i32, i32) {
    %c0_i32 = arith.constant 0 : i32
    %c0_i32_0 = arith.constant 0 : i32
    return %arg0, %c0_i32, %arg1 : i32, i32, i32
  }
}

</mosaic_0001>

<bundles_post_ra>
// kernel: tpu_custom_call.1
= control target key start
LH: loop header
LB: loop body
LE: loop exit
PB: predicated region body
PF: predicated region fallthrough
CT: control target
= control target key end

     0   :  { %s3377_s0 = inlined_call_operand.vmem [shape: f32[2,256,4], index: 0, kind: input, shape index: {}]   ;;  %s3378_s1 = inlined_call_operand.vmem [shape: f32[2,64,4], index: 1, kind: input, shape index: {}]   ;;  %s3379_s2 = inlined_call_operand.vmem [shape: f32[2,64,8], index: 2, kind: input, shape index: {}]   ;;  %s3380_s3 = inlined_call_operand.vmem [shape: f32[2,256,4], index: 3, kind: input, shape index: {}]   ;;  %s3381_s4 = inlined_call_operand.vmem [shape: f32[2,1,4], index: 4, kind: input, shape index: {}]   ;;  %s3382_s5 = inlined_call_operand.vmem [shape: f32[2,1,4], index: 5, kind: input, shape index: {}]   ;;  %s3383_s6 = inlined_call_operand.vmem [shape: f32[4,4], index: 6, kind: input, shape index: {}]   ;;  %s3384_s7 = inlined_call_operand.vmem [shape: f32[1,4], index: 7, kind: input, shape index: {}]   ;;  %s3385_s8 = inlined_call_operand.hbm [shape: f32[2,4,256], index: 8, kind: output, shape index: {}]  }
   0x1   :  { %3386 = sst [smem:[#allocation5_spill]] %s3377_s0 }
   0x2   :  { %3387 = sst [smem:[#allocation6_spill]] %s3378_s1 }
   0x3   :  { %3388 = sst [smem:[#allocation7_spill]] %s3379_s2 }
   0x4   :  { %13 = vsyncpa [#allocation3], 0 }
   0x5   :  { %15 = vsyncpa [#allocation3 + $0x1], 0  ;;  %s2567_s27 = smov 0   ;;  %s2569_s28 = smov 0  }
   0x6   :  { %s2571_s29 = smov 0   ;;  %s2573_s30 = smov 0  }
   0x7   :  { %s2575_s9 = smov 0   ;;  %s2577_s10 = smov 0  }
   0x8   :  { %s2579_s11 = smov 0   ;;  %s2581_s12 = smov 0  }
   0x9 LB: > { %s1960_s13 = sadd.s32 4294967295, %s2517_s12   ;;  %s1961_s14 = sadd.s32 4294967294, %s2517_s12   ;;  %s2517_s12 = sphi %s2581_s12, %s21_s12   ;;  %s2513_s11 = sphi %s2579_s11, %s3402_s11   ;;  %s2509_s10 = sphi %s2577_s10, %s3401_s10   ;;  %s2505_s9 = sphi %s2575_s9, %s3400_s9   ;;  %s2501_s30 = sphi %s2573_s30, %s3399_s30   ;;  %s2497_s29 = sphi %s2571_s29, %s3398_s29   ;;  %s2493_s28 = sphi %s2569_s28, %s3397_s28   ;;  %s2489_s27 = sphi %s2567_s27, %s3396_s27  }
   0xa   : > { %s30_s15 = sadd.s32 1, %s2509_s10  ;;  %s33_s16 = sadd.s32 1, %s2513_s11 }
   0xb   : > { %p31_p0 = scmp.ge.s32.totalorder %s30_s15, 2  ;;  %p254_p1 = scmp.ne.s32.totalorder %s2497_s29, %s2493_s28 }
   0xc   : > { %p255_p2 = scmp.eq.s32.totalorder %s1960_s13, 3  ;;  %p260_p5 = scmp.ne.s32.totalorder %s2493_s28, %s2489_s27 }
   0xd   : > { %s3404_s15 = smov (%p31_p0, %s30_s15), 0  ;;  %s3406_s16 = smov (!%p31_p0, %s33_s16), %s2513_s11 }
   0xe   : > { %s240_s17 = ssub.s32 %s2509_s10, %s3404_s15  ;;  %p2618_p3 = por %p255_p2, %p254_p1 }
   0xf   : > { %p35_p4 = scmp.ge.s32.totalorder %s3406_s16, 2  ;;  %p261_p6 = scmp.eq.s32.totalorder %s1961_s14, 3 }
  0x10   : > { %p1964_p7 = scmp.ge.s32.totalorder %s2517_s12, 1  ;;  %p339_p9 = scmp.lt.s32.totalorder %s2517_s12, 5 }
  0x11   : > { %s3408_s16 = smov (%p35_p4, %s3406_s16), 0  ;;  %p2627_p8 = por %p261_p6, %p260_p5 }
  0x12   : > { %s239_s20 = ssub.s32 %s2513_s11, %s3408_s16  ;;  %s244_s21 = sadd.s32 1, %s2497_s29 }
  0x13   : > { %s241_s22 = sor.u32 %s240_s17, %s239_s20  ;;  %p340_p10 = pnand %p1964_p7, %p339_p9 }
  0x14   : > { %p242_p11 = scmp.eq.s32.totalorder %s241_s22, 0  ;;  %v486_v0 = vld [vmem:[%s3383_s6] sm:$0xf] (!%p340_p10)  ;;  %vm543_vm0 = vcmask (!%p340_p10), 1043456   ;;  %s1966_s26 = sshll.u32 (!%p340_p10), %s2501_s30, 4  ;;  %vm494_vm1 = vcmask (!%p340_p10), 31744  }
  0x15   : > { %343 = sbr.rel (%p340_p10) target bundleno = 1400 (0x578), region = 52  ;;  %p403_p12 = scmp.lt.s32.totalorder (!%p340_p10), %s2505_s9, 1  ;;  %2108 = vmatprep.subr.msk.mxu0 (!%p340_p10), %vm543_vm0, %v486_v0  ;;  %vm2659_vm2 = vmpackc.low (!%p340_p10), %vm494_vm1, %vm494_vm1  ;;  %v1976_v30 = vld [vmem:[%s3384_s7] ss:$0 sm:$0xff] (!%p340_p10)  ;;  %vm909_vm3 = vcmask (!%p340_p10), 523264  }
  0x16   : > { %s2636_s23 = scalar_select %p242_p11, %s2497_s29, %s244_s21  }
  0x17   : > { %p405_p13 = scmp.lt.s32.totalorder (!%p340_p10), %s1966_s26, 31  ;;  %2109 = vmatpush3.msk.msra.mxu0 (!%p340_p10), %vm543_vm0, %v486_v0  ;;  %s3391_s1 = sld [smem:[#allocation6_spill]] (!%p340_p10) }
  0x18   : > { %s3394_s0 = sld [smem:[#allocation5_spill]] (!%p340_p10)  ;;  %s3395_s2 = sld [smem:[#allocation7_spill]] (!%p340_p10) }
  0x1c   : > { %s2644_s13 = scalar_select %p403_p12, %s2505_s9, 1 }
  0x1d   : > { %s3410_s26 = smov (!%p405_p13, %s1966_s26), 31 }
  0x1e   : > { %s1967_s14 = sshll.u32 %s2644_s13, 5  ;;  %s2041_s17 = sshll.u32 %s2644_s13, 6 }
  0x1f   : > { %s2648_s20 = sadd.s32 %s1967_s14, %s3410_s26  ;;  %s2655_s24 = scalar_lea.vmem %s3391_s1, %s2041_s17 }
  0x20   : > { %s1968_s25 = sshll.u32 %s2648_s20, 3  ;;  %v454_v2 = vld [vmem:[%s2655_s24] sm:$0xff]  ;;  %v455_v3 = vld [vmem:[%s2655_s24 + $0x8] sm:$0xff]  ;;  %v456_v4 = vld [vmem:[%s2655_s24 + $0x10] sm:$0xff]  ;;  %s2520_s1 = smov 124  }
  0x21   : > { %s2672_s21 = scalar_lea.vmem %s3394_s0, %s1968_s25  ;;  %v2214_v5 = vpack.c.bf16 %v455_v3, %v454_v2  ;;  %v457_v6 = vld [vmem:[%s2655_s24 + $0x18] sm:$0xff]  ;;  %v458_v13 = vld [vmem:[%s2655_s24 + $0x20] sm:$0xff]  ;;  %v459_v14 = vld [vmem:[%s2655_s24 + $0x28] sm:$0xff]  ;;  %s2519_s0 = smov 4  }
  0x22   : > { %v438_v7 = vld [vmem:[%s2672_s21] sm:$0xff]  ;;  %v439_v8 = vld [vmem:[%s2672_s21 + $0x8] sm:$0xff]  ;;  %v440_v9 = vld [vmem:[%s2672_s21 + $0x10] sm:$0xff]  ;;  %v2220_v10 = vpack.c.bf16 %v457_v6, %v456_v4  ;;  %v2226_v16 = vpack.c.bf16 %v459_v14, %v458_v13  ;;  %s2037_s20 = sshll.u32 %s2505_s9, 1 }
  0x23   : > { %2110 = vmatprep.mubr.msk.f32.mxu0 %vm494_vm1, %v438_v7  ;;  %2216 = vmatprep.subr.msk.bf16.mxu1 %vm2659_vm2, %v2214_v5  ;;  %v441_v11 = vld [vmem:[%s2672_s21 + $0x18] sm:$0xff]  ;;  %v442_v12 = vld [vmem:[%s2672_s21 + $0x20] sm:$0xff]  ;;  %v443_v15 = vld [vmem:[%s2672_s21 + $0x28] sm:$0xff] }
  0x24   : > { %2111 = vmatmul.mubr.msk.f32.vlgmr.msra.gmra.mrb[0].mxu0 %vm494_vm1, %v439_v8  ;;  %2219 = vmatpush3.bf16.xpose.msk.msra.mxu1 %vm2659_vm2, %v2214_v5  ;;  %v444_v17 = vld [vmem:[%s2672_s21 + $0x30] sm:$0xff]  ;;  %v445_v18 = vld [vmem:[%s2672_s21 + $0x38] sm:$0xff]  ;;  %v446_v19 = vld [vmem:[%s2672_s21 + $0x40] sm:$0xff] }
  0x25   : > { %2113 = vmatprep.mubr.msk.f32.mxu0 %vm494_vm1, %v440_v9  ;;  %2222 = vmatprep.subr.msk.bf16.mxu1 %vm2659_vm2, %v2220_v10  ;;  %v460_v20 = vld [vmem:[%s2655_s24 + $0x30] sm:$0xff]  ;;  %v461_v21 = vld [vmem:[%s2655_s24 + $0x38] sm:$0xff]  ;;  %v447_v22 = vld [vmem:[%s2672_s21 + $0x48] sm:$0xff]  ;;  %s2906_s24 = scalar_lea.vmem %s3380_s3, %s1968_s25  ;;  %s1818_s25 = sadd.s32 %s2501_s30, %s2037_s20 }
  0x26   : > { %v2232_v23 = vpack.c.bf16 %v461_v21, %v460_v20  ;;  %v448_v24 = vld [vmem:[%s2672_s21 + $0x50] sm:$0xff]  ;;  %v449_v25 = vld [vmem:[%s2672_s21 + $0x58] sm:$0xff]  ;;  %v450_v26 = vld [vmem:[%s2672_s21 + $0x60] sm:$0xff]  ;;  %s2521_s30 = smov [#allocation2]  }
  0x27   : > { %v451_v27 = vld [vmem:[%s2672_s21 + $0x68] sm:$0xff]  ;;  %v452_v28 = vld [vmem:[%s2672_s21 + $0x70] sm:$0xff]  ;;  %v453_v29 = vld [vmem:[%s2672_s21 + $0x78] sm:$0xff]  ;;  %s2812_s21 = scalar_lea.vmem %s3395_s2, %s2041_s17  ;;  %s437_s2 = scalar_lea.vmem %s3382_s5, %s2644_s13 }
  0x28   : > { %2114 = vmatmul.mubr.msk.f32.gmra.mrb[2].mxu0 %vm494_vm1, %v441_v11  ;;  %s2427_s9 = sshll.u32 %s2521_s30, 4  ;;  %s2428_s9 = int_to_ptr.vmem [resolvable:$false] %s2427_s9 }
  0x29   : > { %2116 = vmatprep.mubr.msk.f32.mxu0 %vm494_vm1, %v442_v12 }
  0x2c   : > { %2117 = vmatmul.mubr.msk.f32.gmra.mrb[4].mxu0 %vm494_vm1, %v443_v15  ;;  %2225 = vmatpush3.bf16.xpose.msk.msra.mxu1 %vm2659_vm2, %v2220_v10 }
  0x2d   : > { %2119 = vmatprep.mubr.msk.f32.mxu0 %vm494_vm1, %v444_v17  ;;  %2228 = vmatprep.subr.msk.bf16.mxu1 %vm2659_vm2, %v2226_v16 }
  0x30   : > { %2120 = vmatmul.mubr.msk.f32.gmra.mrb[6].mxu0 %vm494_vm1, %v445_v18 }
  0x31   : > { %2122 = vmatprep.mubr.msk.f32.mxu0 %vm494_vm1, %v446_v19 }
  0x34   : > { %2123 = vmatmul.mubr.msk.f32.gmra.mrb[8].mxu0 %vm494_vm1, %v447_v22  ;;  %2231 = vmatpush3.bf16.xpose.msk.msra.mxu1 %vm2659_vm2, %v2226_v16 }
  0x35   : > { %2125 = vmatprep.mubr.msk.f32.mxu0 %vm494_vm1, %v448_v24  ;;  %2234 = vmatprep.subr.msk.bf16.mxu1 %vm2659_vm2, %v2232_v23 }
  0x38   : > { %2126 = vmatmul.mubr.msk.f32.gmra.mrb[10].mxu0 %vm494_vm1, %v449_v25 }
  0x39   : > { %2128 = vmatprep.mubr.msk.f32.mxu0 %vm494_vm1, %v450_v26 }
  0x3c   : > { %2129 = vmatmul.mubr.msk.f32.gmra.mrb[12].mxu0 %vm494_vm1, %v451_v27  ;;  %2237 = vmatpush3.bf16.xpose.msk.msra.mxu1 %vm2659_vm2, %v2232_v23 }
  0x3d   : > { %2131 = vmatprep.mubr.msk.f32.mxu0 %vm494_vm1, %v452_v28 }
  0x40   : > { %2132 = vmatmul.mubr.msk.f32.gmra.mrb[14].mxu0 %vm494_vm1, %v453_v29 }
  0xf7   : > { %v2112_v31 = vpop.f32.mrb[0].mxu0 }
  0xf8   : > { %v613_v32 = vpop.f32.mrb[1].mxu0  ;;  %v619_v34 = vadd.f32 %v2112_v31, %v1976_v30  ;;  %v462_v31 = vld [vmem:[%s2812_s21] sm:$0xff] }
  0xf9   : > { %v614_v33 = vadd.f32 %v1976_v30, %v613_v32  ;;  %v463_v32 = vld [vmem:[%s2812_s21 + $0x8] sm:$0xff] }
  0xfb   : > { %v2115_v35 = vpop.f32.mrb[2].mxu0  ;;  %2150 = vmatprep.mubr.msk.f32.mxu1 %vm494_vm1, %v614_v33  ;;  %v464_v33 = vld [vmem:[%s2812_s21 + $0x10] sm:$0xff] }
  0xfc   : > { %v629_v36 = vadd.f32 %v2115_v35, %v1976_v30  ;;  %v623_v37 = vpop.f32.mrb[3].mxu0  ;;  %2151 = vmatmul.mubr.msk.f32.vlgmr.msra.gmra.mrb[0].mxu1 %vm494_vm1, %v619_v34  ;;  %v2238_v34 = vpack.c.bf16 %v463_v32, %v462_v31  ;;  %v465_v35 = vld [vmem:[%s2812_s21 + $0x18] sm:$0xff] }
  0xfd   : > { %v624_v38 = vadd.f32 %v1976_v30, %v623_v37 }
  0xfe   : > { %2239 = vmatprep.subr.bf16.mxu0 %v2238_v34 }
  0xff   : > { %v2118_v39 = vpop.f32.mrb[4].mxu0  ;;  %2153 = vmatprep.mubr.msk.f32.mxu1 %vm494_vm1, %v624_v38  ;;  %2241 = vmatpush3.bf16.msra.mxu0 %v2238_v34 }
 0x100   : > { %v639_v40 = vadd.f32 %v2118_v39, %v1976_v30  ;;  %v633_v41 = vpop.f32.mrb[5].mxu0  ;;  %2154 = vmatmul.mubr.msk.f32.gmra.mrb[2].mxu1 %vm494_vm1, %v629_v36  ;;  %v2242_v36 = vpack.c.bf16 %v465_v35, %v464_v33 }
 0x101   : > { %v634_v42 = vadd.f32 %v1976_v30, %v633_v41 }
 0x102   : > { %2243 = vmatprep.subr.bf16.mxu0 %v2242_v36 }
 0x103   : > { %v2121_v43 = vpop.f32.mrb[6].mxu0  ;;  %2156 = vmatprep.mubr.msk.f32.mxu1 %vm494_vm1, %v634_v42  ;;  %2245 = vmatpush3.bf16.msra.mxu0 %v2242_v36  ;;  %v466_v36 = vld [vmem:[%s2812_s21 + $0x20] sm:$0xff] }
 0x104   : > { %v649_v44 = vadd.f32 %v2121_v43, %v1976_v30  ;;  %v643_v45 = vpop.f32.mrb[7].mxu0  ;;  %2157 = vmatmul.mubr.msk.f32.gmra.mrb[4].mxu1 %vm494_vm1, %v639_v40 }
 0x105   : > { %v644_v46 = vadd.f32 %v1976_v30, %v643_v45 }
 0x107   : > { %v2124_v47 = vpop.f32.mrb[8].mxu0  ;;  %2159 = vmatprep.mubr.msk.f32.mxu1 %vm494_vm1, %v644_v46 }
 0x108   : > { %v659_v48 = vadd.f32 %v2124_v47, %v1976_v30  ;;  %v653_v49 = vpop.f32.mrb[9].mxu0  ;;  %2160 = vmatmul.mubr.msk.f32.gmra.mrb[6].mxu1 %vm494_vm1, %v649_v44 }
 0x109   : > { %v654_v50 = vadd.f32 %v1976_v30, %v653_v49 }
 0x10b   : > { %v2127_v51 = vpop.f32.mrb[10].mxu0  ;;  %2162 = vmatprep.mubr.msk.f32.mxu1 %vm494_vm1, %v654_v50 }
 0x10c   : > { %v669_v52 = vadd.f32 %v2127_v51, %v1976_v30  ;;  %v663_v53 = vpop.f32.mrb[11].mxu0  ;;  %2163 = vmatmul.mubr.msk.f32.gmra.mrb[8].mxu1 %vm494_vm1, %v659_v48 }
 0x10d   : > { %v664_v54 = vadd.f32 %v1976_v30, %v663_v53 }
 0x10f   : > { %v2130_v55 = vpop.f32.mrb[12].mxu0  ;;  %2165 = vmatprep.mubr.msk.f32.mxu1 %vm494_vm1, %v664_v54 }
 0x110   : > { %v679_v56 = vadd.f32 %v2130_v55, %v1976_v30  ;;  %v673_v57 = vpop.f32.mrb[13].mxu0  ;;  %2166 = vmatmul.mubr.msk.f32.gmra.mrb[10].mxu1 %vm494_vm1, %v669_v52 }
 0x111   : > { %v674_v58 = vadd.f32 %v1976_v30, %v673_v57 }
 0x113   : > { %v2133_v59 = vpop.f32.mrb[14].mxu0  ;;  %2168 = vmatprep.mubr.msk.f32.mxu1 %vm494_vm1, %v674_v58 }
 0x114   : > { %v689_v60 = vadd.f32 %v2133_v59, %v1976_v30  ;;  %v683_v61 = vpop.f32.mrb[15].mxu0  ;;  %2169 = vmatmul.mubr.msk.f32.gmra.mrb[12].mxu1 %vm494_vm1, %v679_v56 }
 0x115   : > { %v684_v62 = vadd.f32 %v1976_v30, %v683_v61 }
 0x117   : > { %2171 = vmatprep.mubr.msk.f32.mxu1 %vm494_vm1, %v684_v62 }
 0x118   : > { %2172 = vmatmul.mubr.msk.f32.gmra.mrb[14].mxu1 %vm494_vm1, %v689_v60 }
 0x1cf   : > { %v2746_v63 = vpop.f32.mrb[0].mxu1 }
 0x1d0   : > { %v830_v0 = vpop.f32.mrb[1].mxu1  ;;  %v913_v4 = vsel %vm909_vm3, %v2746_v63, -inf }
 0x1d1   : > { %v910_v1 = vsel %vm909_vm3, %v830_v0, -inf }
 0x1d2   : > { %911 = vmax.xlane.f32.xlu0 %v910_v1 }
 0x1d3   : > { %v2749_v2 = vpop.f32.mrb[2].mxu1 }
 0x1d4   : > { %v2751_v3 = vpop.f32.mrb[3].mxu1  ;;  %v919_v8 = vsel %vm909_vm3, %v2749_v2, -inf }
 0x1d5   : > { %v916_v5 = vsel %vm909_vm3, %v2751_v3, -inf }
 0x1d6   : > { %914 = vmax.xlane.f32.xlu0 %v913_v4  ;;  %917 = vmax.xlane.f32.xlu1 %v916_v5 }
 0x1d7   : > { %v2757_v6 = vpop.f32.mrb[4].mxu1 }
 0x1d8   : > { %v2759_v7 = vpop.f32.mrb[5].mxu1  ;;  %v925_v11 = vsel %vm909_vm3, %v2757_v6, -inf }
 0x1d9   : > { %v922_v9 = vsel %vm909_vm3, %v2759_v7, -inf }
 0x1da   : > { %920 = vmax.xlane.f32.xlu1 %v919_v8  ;;  %923 = vmax.xlane.f32.xlu0 %v922_v9 }
 0x1db   : > { %v2765_v10 = vpop.f32.mrb[6].mxu1 }
 0x1dc   : > { %v2769_v12 = vpop.f32.mrb[7].mxu1  ;;  %v931_v15 = vsel %vm909_vm3, %v2765_v10, -inf }
 0x1dd   : > { %v928_v13 = vsel %vm909_vm3, %v2769_v12, -inf }
 0x1de   : > { %926 = vmax.xlane.f32.xlu1 %v925_v11  ;;  %929 = vmax.xlane.f32.xlu0 %v928_v13 }
 0x1df   : > { %v2773_v14 = vpop.f32.mrb[8].mxu1 }
 0x1e0   : > { %v2777_v16 = vpop.f32.mrb[9].mxu1  ;;  %v937_v19 = vsel %vm909_vm3, %v2773_v14, -inf }
 0x1e1   : > { %v934_v17 = vsel %vm909_vm3, %v2777_v16, -inf }
 0x1e2   : > { %932 = vmax.xlane.f32.xlu1 %v931_v15  ;;  %935 = vmax.xlane.f32.xlu0 %v934_v17 }
 0x1e3   : > { %v2781_v18 = vpop.f32.mrb[10].mxu1 }
 0x1e4   : > { %v2785_v20 = vpop.f32.mrb[11].mxu1  ;;  %v943_v23 = vsel %vm909_vm3, %v2781_v18, -inf }
 0x1e5   : > { %v940_v21 = vsel %vm909_vm3, %v2785_v20, -inf }
 0x1e6   : > { %938 = vmax.xlane.f32.xlu1 %v937_v19  ;;  %941 = vmax.xlane.f32.xlu0 %v940_v21 }
 0x1e7   : > { %v2789_v22 = vpop.f32.mrb[12].mxu1 }
 0x1e8   : > { %v2793_v24 = vpop.f32.mrb[13].mxu1  ;;  %v949_v27 = vsel %vm909_vm3, %v2789_v22, -inf }
 0x1e9   : > { %v946_v25 = vsel %vm909_vm3, %v2793_v24, -inf }
 0x1ea   : > { %944 = vmax.xlane.f32.xlu1 %v943_v23  ;;  %947 = vmax.xlane.f32.xlu0 %v946_v25 }
 0x1eb   : > { %v2797_v26 = vpop.f32.mrb[14].mxu1 }
 0x1ec   : > { %v2801_v28 = vpop.f32.mrb[15].mxu1  ;;  %v955_v30 = vsel %vm909_vm3, %v2797_v26, -inf }
 0x1ed   : > { %v952_v29 = vsel %vm909_vm3, %v2801_v28, -inf }
 0x1ee   : > { %950 = vmax.xlane.f32.xlu1 %v949_v27  ;;  %953 = vmax.xlane.f32.xlu0 %v952_v29 }
 0x1f2   : > { %956 = vmax.xlane.f32.xlu1 %v955_v30 }
 0x25f   : > { %v912_v37 = vpop.xlane.xlu0 %911 }
 0x260   : > { %v958_v38 = vsub.f32 %v830_v0, %v912_v37  ;;  %v467_v37 = vld [vmem:[%s2812_s21 + $0x28] sm:$0xff] }
 0x262   : > { %v974_v39 = vmul.f32 1.442695, %v958_v38 }
 0x263   : > { %v915_v40 = vpop.xlane.xlu0 %914  ;;  %v918_v41 = vpop.xlane.xlu1 %917 }
 0x264   : > { %2327 = vpow2.f32 %v974_v39  ;;  %v959_v42 = vsub.f32 %v2746_v63, %v915_v40  ;;  %v960_v43 = vsub.f32 %v2751_v3, %v918_v41  ;;  %v2246_v40 = vpack.c.bf16 %v467_v37, %v466_v36  ;;  %v480_v37 = vld [vmem:[%s2906_s24 + $0x50] sm:$0xff] }
 0x266   : > { %v976_v44 = vmul.f32 1.442695, %v959_v42  ;;  %v978_v45 = vmul.f32 1.442695, %v960_v43  ;;  %2247 = vmatprep.subr.bf16.mxu0 %v2246_v40 }
 0x267   : > { %v921_v46 = vpop.xlane.xlu1 %920  ;;  %v924_v47 = vpop.xlane.xlu0 %923  ;;  %2249 = vmatpush3.bf16.msra.mxu0 %v2246_v40 }
 0x268   : > { %2329 = vpow2.f32 %v976_v44  ;;  %v961_v48 = vsub.f32 %v2749_v2, %v921_v46  ;;  %v962_v49 = vsub.f32 %v2759_v7, %v924_v47 }
 0x269   : > { %2331 = vpow2.f32 %v978_v45 }
 0x26a   : > { %v980_v50 = vmul.f32 1.442695, %v961_v48  ;;  %v982_v51 = vmul.f32 1.442695, %v962_v49 }
 0x26b   : > { %v927_v52 = vpop.xlane.xlu1 %926  ;;  %v930_v53 = vpop.xlane.xlu0 %929 }
 0x26c   : > { %2333 = vpow2.f32 %v980_v50  ;;  %v963_v54 = vsub.f32 %v2757_v6, %v927_v52  ;;  %v964_v55 = vsub.f32 %v2769_v12, %v930_v53  ;;  %v468_v50 = vld [vmem:[%s2812_s21 + $0x30] sm:$0xff] }
 0x26d   : > { %2335 = vpow2.f32 %v982_v51  ;;  %v469_v51 = vld [vmem:[%s2812_s21 + $0x38] sm:$0xff]  ;;  %s434_s21 = scalar_lea.vmem %s3381_s4, %s2644_s13 }
 0x26e   : > { %v2824_v56 = vpop.eup %2327  ;;  %v984_v57 = vmul.f32 1.442695, %v963_v54  ;;  %v986_v58 = vmul.f32 1.442695, %v964_v55  ;;  %v2250_v53 = vpack.c.bf16 %v469_v51, %v468_v50 }
 0x26f   : > { %v933_v59 = vpop.xlane.xlu1 %932  ;;  %v936_v60 = vpop.xlane.xlu0 %935  ;;  %v1006_v61 = vsel %vm909_vm3, %v2824_v56, 0.0 }
 0x270   : > { %2337 = vpow2.f32 %v984_v57  ;;  %v965_v62 = vsub.f32 %v2765_v10, %v933_v59  ;;  %v966_v63 = vsub.f32 %v2777_v16, %v936_v60  ;;  %1007 = vadd.xlane.f32.xlu0 %v1006_v61  ;;  %2251 = vmatprep.subr.bf16.mxu0 %v2250_v53  ;;  %v472_v60 = vld [vmem:[%s2906_s24 + $0x10] sm:$0xff]  ;;  %v474_v61 = vld [vmem:[%s2906_s24 + $0x20] sm:$0xff] }
 0x271   : > { %2339 = vpow2.f32 %v986_v58  ;;  %2253 = vmatpush3.bf16.msra.mxu0 %v2250_v53 }
 0x272   : > { %v2830_v0 = vpop.eup %2329  ;;  %v988_v1 = vmul.f32 1.442695, %v965_v62  ;;  %v990_v2 = vmul.f32 1.442695, %v966_v63  ;;  %v2918_v62 = vld [vmem:[%s434_s21] ss:$0 sm:$0xff] }
 0x273   : > { %v2832_v3 = vpop.eup %2331  ;;  %v939_v4 = vpop.xlane.xlu1 %938  ;;  %v1009_v6 = vsel %vm909_vm3, %v2830_v0, 0.0  ;;  %v2920_v63 = vld [vmem:[%s437_s2] ss:$0 sm:$0xff]  ;;  %s399_s2 = sand.u32 1, %s2493_s28  }
 0x274   : > { %v942_v5 = vpop.xlane.xlu0 %941  ;;  %2341 = vpow2.f32 %v988_v1  ;;  %v967_v7 = vsub.f32 %v2773_v14, %v939_v4  ;;  %1010 = vadd.xlane.f32.xlu1 %v1009_v6  ;;  %v1012_v9 = vsel %vm909_vm3, %v2832_v3, 0.0  ;;  %v470_v1 = vld [vmem:[%s2906_s24] sm:$0xff]  ;;  %v1514_v4 = vsub.f32 %v474_v61, %v2918_v62  ;;  %s1965_s13 = sshll.u32 %s399_s2, 2 }
 0x275   : > { %v968_v8 = vsub.f32 %v2785_v20, %v942_v5  ;;  %2343 = vpow2.f32 %v990_v2  ;;  %1013 = vadd.xlane.f32.xlu0 %v1012_v9  ;;  %v1512_v2 = vsub.f32 %v472_v60, %v2918_v62  ;;  %v476_v5 = vld [vmem:[%s2906_s24 + $0x30] sm:$0xff]  ;;  %v1510_v6 = vsub.f32 %v470_v1, %v2918_v62  ;;  %v473_v9 = vld [vmem:[%s2906_s24 + $0x18] sm:$0xff]  ;;  %s401_s17 = scalar_lea.vmem [#allocation2], %s1965_s13  ;;  %s2429_s13 = scalar_lea.vmem %s2428_s9, 128 }
 0x276   : > { %v2840_v10 = vpop.eup %2333  ;;  %v992_v11 = vmul.f32 1.442695, %v967_v7  ;;  %v471_v7 = vld [vmem:[%s2906_s24 + $0x8] sm:$0xff]  ;;  %s1822_s22 = sshll.u32 %s401_s17, 4  ;;  %s3321_s22 = int_to_ptr.vmem [resolvable:$true] %s1822_s22 }
 0x277   : > { %v994_v12 = vmul.f32 1.442695, %v968_v8  ;;  %v2842_v13 = vpop.eup %2335  ;;  %v945_v15 = vpop.xlane.xlu1 %944  ;;  %v1015_v17 = vsel %vm909_vm3, %v2840_v10, 0.0  ;;  %v1511_v8 = vsub.f32 %v471_v7, %v2918_v62  ;;  %p2430_p4 = scmp.lt.s32.totalorder %s3321_s22, %s2428_s9 }
 0x278   : > { %v948_v16 = vpop.xlane.xlu0 %947  ;;  %2345 = vpow2.f32 %v992_v11  ;;  %v969_v14 = vsub.f32 %v2781_v18, %v945_v15  ;;  %1016 = vadd.xlane.f32.xlu1 %v1015_v17  ;;  %v1018_v20 = vsel %vm909_vm3, %v2842_v13, 0.0  ;;  %v1535_v11 = vmul.f32 %v2920_v63, %v1512_v2  ;;  %v477_v17 = vld [vmem:[%s2906_s24 + $0x38] sm:$0xff] }
 0x279   : > { %v970_v19 = vsub.f32 %v2793_v24, %v948_v16  ;;  %2347 = vpow2.f32 %v994_v12  ;;  %1019 = vadd.xlane.f32.xlu0 %v1018_v20  ;;  %v1533_v12 = vmul.f32 %v2920_v63, %v1510_v6  ;;  %v1516_v15 = vsub.f32 %v476_v5, %v2918_v62  ;;  %v475_v20 = vld [vmem:[%s2906_s24 + $0x28] sm:$0xff] }
 0x27a   : > { %v2850_v21 = vpop.eup %2337  ;;  %v996_v23 = vmul.f32 1.442695, %v969_v14  ;;  %v1537_v16 = vmul.f32 %v2920_v63, %v1514_v4  ;;  %v1534_v14 = vmul.f32 %v2920_v63, %v1511_v8 }
 0x27b   : > { %v998_v25 = vmul.f32 1.442695, %v970_v19  ;;  %v2852_v27 = vpop.eup %2339  ;;  %v951_v29 = vpop.xlane.xlu1 %950  ;;  %v1021_v18 = vsel %vm909_vm3, %v2850_v21, 0.0  ;;  %v1513_v19 = vsub.f32 %v473_v9, %v2918_v62 }
 0x27c   : > { %v954_v30 = vpop.xlane.xlu0 %953  ;;  %2349 = vpow2.f32 %v996_v23  ;;  %v971_v24 = vsub.f32 %v2789_v22, %v951_v29  ;;  %1022 = vadd.xlane.f32.xlu1 %v1021_v18  ;;  %v1024_v32 = vsel %vm909_vm3, %v2852_v27, 0.0  ;;  %v1517_v23 = vsub.f32 %v477_v17, %v2918_v62  ;;  %v478_v18 = vld [vmem:[%s2906_s24 + $0x40] sm:$0xff] }
 0x27d   : > { %v972_v31 = vsub.f32 %v2801_v28, %v954_v30  ;;  %2351 = vpow2.f32 %v998_v25  ;;  %1025 = vadd.xlane.f32.xlu0 %v1024_v32  ;;  %v1539_v25 = vmul.f32 %v2920_v63, %v1516_v15  ;;  %v1536_v29 = vmul.f32 %v2920_v63, %v1513_v19 }
 0x27e   : > { %v2860_v33 = vpop.eup %2341  ;;  %v1000_v34 = vmul.f32 1.442695, %v971_v24  ;;  %v1515_v30 = vsub.f32 %v475_v20, %v2918_v62  ;;  %v1540_v24 = vmul.f32 %v2920_v63, %v1517_v23 }
 0x27f   : > { %v1002_v35 = vmul.f32 1.442695, %v972_v31  ;;  %v2864_v38 = vpop.eup %2343  ;;  %v957_v39 = vpop.xlane.xlu1 %956  ;;  %v1027_v22 = vsel %vm909_vm3, %v2860_v33, 0.0  ;;  %v1518_v31 = vsub.f32 %v478_v18, %v2918_v62 }
 0x280   : > { %2353 = vpow2.f32 %v1000_v34  ;;  %v973_v28 = vsub.f32 %v2797_v26, %v957_v39  ;;  %1028 = vadd.xlane.f32.xlu1 %v1027_v22  ;;  %v1030_v41 = vsel %vm909_vm3, %v2864_v38, 0.0  ;;  %v1538_v32 = vmul.f32 %v2920_v63, %v1515_v30  ;;  %v479_v34 = vld [vmem:[%s2906_s24 + $0x48] sm:$0xff] }
 0x281   : > { %2355 = vpow2.f32 %v1002_v35  ;;  %1031 = vadd.xlane.f32.xlu0 %v1030_v41  ;;  %v1541_v35 = vmul.f32 %v2920_v63, %v1518_v31  ;;  %v1519_v36 = vsub.f32 %v479_v34, %v2918_v62  ;;  %v1520_v22 = vsub.f32 %v480_v37, %v2918_v62 }
 0x282   : > { %v2871_v42 = vpop.eup %2345  ;;  %v1004_v43 = vmul.f32 1.442695, %v973_v28 }
 0x283   : > { %v2873_v44 = vpop.eup %2347  ;;  %v1033_v45 = vsel %vm909_vm3, %v2871_v42, 0.0  ;;  %v1542_v39 = vmul.f32 %v2920_v63, %v1519_v36  ;;  %v1543_v40 = vmul.f32 %v2920_v63, %v1520_v22 }
 0x284   : > { %2357 = vpow2.f32 %v1004_v43  ;;  %1034 = vadd.xlane.f32.xlu1 %v1033_v45  ;;  %v1036_v26 = vsel %vm909_vm3, %v2873_v44, 0.0 }
 0x285   : > { %1037 = vadd.xlane.f32.xlu0 %v1036_v26 }
 0x286   : > { %v2879_v46 = vpop.eup %2349 }
 0x287   : > { %v2881_v47 = vpop.eup %2351  ;;  %v1039_v48 = vsel %vm909_vm3, %v2879_v46, 0.0 }
 0x288   : > { %1040 = vadd.xlane.f32.xlu1 %v1039_v48  ;;  %v1042_v49 = vsel %vm909_vm3, %v2881_v47, 0.0 }
 0x289   : > { %1043 = vadd.xlane.f32.xlu0 %v1042_v49 }
 0x28a   : > { %v2889_v52 = vpop.eup %2353 }
 0x28b   : > { %v2891_v54 = vpop.eup %2355  ;;  %v1045_v55 = vsel %vm909_vm3, %v2889_v52, 0.0 }
 0x28c   : > { %1046 = vadd.xlane.f32.xlu1 %v1045_v55  ;;  %v1048_v57 = vsel %vm909_vm3, %v2891_v54, 0.0 }
 0x28d   : > { %1049 = vadd.xlane.f32.xlu0 %v1048_v57 }
 0x28e   : > { %v2897_v58 = vpop.eup %2357 }
 0x28f   : > { %v1051_v59 = vsel %vm909_vm3, %v2897_v58, 0.0 }
 0x290   : > { %1052 = vadd.xlane.f32.xlu1 %v1051_v59 }
 0x2a1   : > { %1569 = vrot.lane.b32.xlu1 %v1535_v11, %s2519_s0 }
 0x2a3   : > { %1565 = vrot.lane.b32.xlu0 %v1533_v12, %s2519_s0 }
 0x2a5   : > { %1573 = vrot.lane.b32.xlu1 %v1537_v16, %s2519_s0 }
 0x2a7   : > { %1567 = vrot.lane.b32.xlu0 %v1534_v14, %s2519_s0 }
 0x2a9   : > { %1577 = vrot.lane.b32.xlu1 %v1539_v25, %s2519_s0 }
 0x2ab   : > { %1571 = vrot.lane.b32.xlu0 %v1536_v29, %s2519_s0 }
 0x2ad   : > { %1579 = vrot.lane.b32.xlu1 %v1540_v24, %s2519_s0 }
 0x2af   : > { %1575 = vrot.lane.b32.xlu0 %v1538_v32, %s2519_s0 }
 0x2b1   : > { %1581 = vrot.lane.b32.xlu1 %v1541_v35, %s2519_s0 }
 0x2b5   : > { %1583 = vrot.lane.b32.xlu1 %v1542_v39, %s2519_s0 }
 0x2b9   : > { %1585 = vrot.lane.b32.xlu1 %v1543_v40, %s2519_s0 }
 0x2fd   : > { %v1008_v28 = vpop.xlane.xlu0 %1007 }
 0x2fe   : > { %2359 = vrcp.f32 %v1008_v28 }
 0x301   : > { %v1011_v41 = vpop.xlane.xlu1 %1010 }
 0x302   : > { %2361 = vrcp.f32 %v1011_v41  ;;  %v1014_v43 = vpop.xlane.xlu0 %1013 }
 0x303   : > { %2363 = vrcp.f32 %v1014_v43 }
 0x305   : > { %v1017_v45 = vpop.xlane.xlu1 %1016 }
 0x306   : > { %2365 = vrcp.f32 %v1017_v45  ;;  %v1020_v26 = vpop.xlane.xlu0 %1019 }
 0x307   : > { %2367 = vrcp.f32 %v1020_v26 }
 0x308   : > { %v2360_v48 = vpop.eup %2359 }
 0x309   : > { %v1023_v49 = vpop.xlane.xlu1 %1022  ;;  %v1070_v50 = vmul.f32 %v2360_v48, %v2824_v56 }
 0x30a   : > { %2369 = vrcp.f32 %v1023_v49  ;;  %v1026_v51 = vpop.xlane.xlu0 %1025 }
 0x30b   : > { %2371 = vrcp.f32 %v1026_v51  ;;  %2190 = vmatprep.mubr.msk.f32.mxu0 %vm909_vm3, %v1070_v50 }
 0x30c   : > { %v2362_v53 = vpop.eup %2361 }
 0x30d   : > { %v2364_v55 = vpop.eup %2363  ;;  %v1071_v57 = vmul.f32 %v2362_v53, %v2830_v0  ;;  %v1029_v59 = vpop.xlane.xlu1 %1028 }
 0x30e   : > { %2373 = vrcp.f32 %v1029_v59  ;;  %v1032_v60 = vpop.xlane.xlu0 %1031  ;;  %v1072_v61 = vmul.f32 %v2364_v55, %v2832_v3 }
 0x30f   : > { %2375 = vrcp.f32 %v1032_v60  ;;  %2191 = vmatmul.mubr.msk.f32.vlgmr.msra.gmra.mrb[16].mxu0 %vm909_vm3, %v1071_v57  ;;  %v481_v60 = vld [vmem:[%s2906_s24 + $0x58] sm:$0xff] }
 0x310   : > { %v2366_v1 = vpop.eup %2365  ;;  %2193 = vmatprep.mubr.msk.f32.mxu0 %vm909_vm3, %v1072_v61 }
 0x311   : > { %v2368_v56 = vpop.eup %2367  ;;  %v1035_v2 = vpop.xlane.xlu1 %1034  ;;  %v1073_v4 = vmul.f32 %v2366_v1, %v2840_v10  ;;  %v1521_v1 = vsub.f32 %v481_v60, %v2918_v62 }
 0x312   : > { %2377 = vrcp.f32 %v1035_v2  ;;  %v1038_v5 = vpop.xlane.xlu0 %1037  ;;  %v1074_v6 = vmul.f32 %v2368_v56, %v2842_v13  ;;  %v482_v2 = vld [vmem:[%s2906_s24 + $0x60] sm:$0xff] }
 0x313   : > { %2379 = vrcp.f32 %v1038_v5  ;;  %2194 = vmatmul.mubr.msk.f32.gmra.mrb[18].mxu0 %vm909_vm3, %v1073_v4  ;;  %v1544_v5 = vmul.f32 %v2920_v63, %v1521_v1 }
 0x314   : > { %v2370_v0 = vpop.eup %2369  ;;  %2196 = vmatprep.mubr.msk.f32.mxu0 %vm909_vm3, %v1074_v6  ;;  %v1522_v6 = vsub.f32 %v482_v2, %v2918_v62 }
 0x315   : > { %v2372_v3 = vpop.eup %2371  ;;  %v1041_v7 = vpop.xlane.xlu1 %1040  ;;  %v1075_v8 = vmul.f32 %v2370_v0, %v2850_v21 }
 0x316   : > { %2381 = vrcp.f32 %v1041_v7  ;;  %v1044_v9 = vpop.xlane.xlu0 %1043  ;;  %v1076_v11 = vmul.f32 %v2372_v3, %v2852_v27  ;;  %v483_v3 = vld [vmem:[%s2906_s24 + $0x68] sm:$0xff]  ;;  %v1545_v7 = vmul.f32 %v2920_v63, %v1522_v6 }
 0x317   : > { %2383 = vrcp.f32 %v1044_v9  ;;  %2197 = vmatmul.mubr.msk.f32.gmra.mrb[20].mxu0 %vm909_vm3, %v1075_v8  ;;  %v1523_v8 = vsub.f32 %v483_v3, %v2918_v62 }
 0x318   : > { %v2374_v10 = vpop.eup %2373  ;;  %2199 = vmatprep.mubr.msk.f32.mxu0 %vm909_vm3, %v1076_v11  ;;  %v484_v11 = vld [vmem:[%s2906_s24 + $0x70] sm:$0xff] }
 0x319   : > { %v2376_v13 = vpop.eup %2375  ;;  %v1047_v12 = vpop.xlane.xlu1 %1046  ;;  %v1077_v15 = vmul.f32 %v2374_v10, %v2860_v33  ;;  %v1546_v10 = vmul.f32 %v2920_v63, %v1523_v8 }
 0x31a   : > { %2385 = vrcp.f32 %v1047_v12  ;;  %v1050_v16 = vpop.xlane.xlu0 %1049  ;;  %v1078_v17 = vmul.f32 %v2376_v13, %v2864_v38  ;;  %v1524_v13 = vsub.f32 %v484_v11, %v2918_v62  ;;  %v485_v12 = vld [vmem:[%s2906_s24 + $0x78] sm:$0xff]  ;;  %s2038_s24 = sshll.u32 %s1818_s25, 6 }
 0x31b   : > { %2387 = vrcp.f32 %v1050_v16  ;;  %2200 = vmatmul.mubr.msk.f32.gmra.mrb[22].mxu0 %vm909_vm3, %v1077_v15  ;;  %v1525_v16 = vsub.f32 %v485_v12, %v2918_v62  ;;  %s3326_s21 = scalar_lea.hbm %s3385_s8, %s2038_s24 }
 0x31c   : > { %v2378_v21 = vpop.eup %2377  ;;  %2202 = vmatprep.mubr.msk.f32.mxu0 %vm909_vm3, %v1078_v17  ;;  %v1547_v15 = vmul.f32 %v2920_v63, %v1524_v13 }
 0x31d   : > { %v2380_v27 = vpop.eup %2379  ;;  %v1053_v14 = vpop.xlane.xlu1 %1052  ;;  %v1079_v19 = vmul.f32 %v2378_v21, %v2871_v42  ;;  %v1548_v17 = vmul.f32 %v2920_v63, %v1525_v16 }
 0x31e   : > { %2389 = vrcp.f32 %v1053_v14  ;;  %v1080_v20 = vmul.f32 %v2380_v27, %v2873_v44  ;;  %v1566_v63 = vpop.permute.xlu0 %1565 }
 0x31f   : > { %2203 = vmatmul.mubr.msk.f32.gmra.mrb[24].mxu0 %vm909_vm3, %v1079_v19 }
 0x320   : > { %v2382_v33 = vpop.eup %2381  ;;  %2205 = vmatprep.mubr.msk.f32.mxu0 %vm909_vm3, %v1080_v20 }
 0x321   : > { %v2384_v23 = vpop.eup %2383  ;;  %v1081_v38 = vmul.f32 %v2382_v33, %v2879_v46  ;;  %v3128_v62 = vpop.permute.xlu1 %1569 }
 0x322   : > { %v1082_v25 = vmul.f32 %v2384_v23, %v2881_v47  ;;  %v1568_v19 = vpop.permute.xlu0 %1567 }
 0x323   : > { %2206 = vmatmul.mubr.msk.f32.gmra.mrb[26].mxu0 %vm909_vm3, %v1081_v38 }
 0x324   : > { %v2386_v29 = vpop.eup %2385  ;;  %2208 = vmatprep.mubr.msk.f32.mxu0 %vm909_vm3, %v1082_v25 }
 0x325   : > { %v2388_v30 = vpop.eup %2387  ;;  %v1083_v42 = vmul.f32 %v2386_v29, %v2889_v52  ;;  %v3130_v21 = vpop.permute.xlu1 %1573 }
 0x326   : > { %v1084_v44 = vmul.f32 %v2388_v30, %v2891_v54  ;;  %v3138_v33 = vpop.permute.xlu0 %1571 }
 0x327   : > { %2209 = vmatmul.mubr.msk.f32.gmra.mrb[28].mxu0 %vm909_vm3, %v1083_v42 }
 0x328   : > { %v2390_v18 = vpop.eup %2389  ;;  %2211 = vmatprep.mubr.msk.f32.mxu0 %vm909_vm3, %v1084_v44 }
 0x329   : > { %v1085_v24 = vmul.f32 %v2390_v18, %v2897_v58  ;;  %v3132_v27 = vpop.permute.xlu1 %1577 }
 0x32a   : > { %v3142_v38 = vpop.permute.xlu0 %1575 }
 0x32b   : > { %2212 = vmatmul.mubr.msk.f32.gmra.mrb[30].mxu0 %vm909_vm3, %v1085_v24 }
 0x32d   : > { %v3134_v14 = vpop.permute.xlu1 %1579 }
 0x331   : > { %v3136_v20 = vpop.permute.xlu1 %1581 }
 0x335   : > { %v3140_v23 = vpop.permute.xlu1 %1583 }
 0x339   : > { %v3144_v25 = vpop.permute.xlu1 %1585 }
 0x3e2   : > { %v2996_v46 = vpop.f32.mrb[16].mxu0 }
 0x3e3   : > { %1647 = vrot.lane.b32.xlu0 %v2996_v46, %s2519_s0  ;;  %v3000_v47 = vpop.f32.mrb[17].mxu0  ;;  %v1280_v54 = vmul.f32 %v2996_v46, %v2996_v46 }
 0x3e4   : > { %v1279_v52 = vmul.f32 %v3000_v47, %v3000_v47  ;;  %1645 = vrot.lane.b32.xlu1 %v3000_v47, %s2519_s0 }
 0x3e6   : > { %v3008_v31 = vpop.f32.mrb[18].mxu0 }
 0x3e7   : > { %1311 = vrot.lane.b32.xlu0 %v1279_v52, %s2519_s0  ;;  %v3011_v58 = vpop.f32.mrb[19].mxu0  ;;  %v1282_v35 = vmul.f32 %v3008_v31, %v3008_v31 }
 0x3e8   : > { %1313 = vrot.lane.b32.xlu1 %v1280_v54, %s2519_s0  ;;  %v1281_v22 = vmul.f32 %v3011_v58, %v3011_v58 }
 0x3ea   : > { %v3014_v32 = vpop.f32.mrb[20].mxu0 }
 0x3eb   : > { %1651 = vrot.lane.b32.xlu0 %v3008_v31, %s2519_s0  ;;  %v3018_v34 = vpop.f32.mrb[21].mxu0  ;;  %v1284_v45 = vmul.f32 %v3014_v32, %v3014_v32 }
 0x3ec   : > { %1649 = vrot.lane.b32.xlu1 %v3011_v58, %s2519_s0  ;;  %v1283_v39 = vmul.f32 %v3018_v34, %v3018_v34 }
 0x3ee   : > { %v3024_v36 = vpop.f32.mrb[22].mxu0 }
 0x3ef   : > { %1655 = vrot.lane.b32.xlu0 %v3014_v32, %s2519_s0  ;;  %v3028_v37 = vpop.f32.mrb[23].mxu0  ;;  %v1286_v50 = vmul.f32 %v3024_v36, %v3024_v36 }
 0x3f0   : > { %1317 = vrot.lane.b32.xlu1 %v1282_v35, %s2519_s0  ;;  %v1285_v49 = vmul.f32 %v3028_v37, %v3028_v37 }
 0x3f2   : > { %v3035_v40 = vpop.f32.mrb[24].mxu0 }
 0x3f3   : > { %1319 = vrot.lane.b32.xlu0 %v1283_v39, %s2519_s0  ;;  %v3038_v28 = vpop.f32.mrb[25].mxu0  ;;  %v1288_v55 = vmul.f32 %v3035_v40, %v3035_v40 }
 0x3f4   : > { %1315 = vrot.lane.b32.xlu1 %v1281_v22, %s2519_s0  ;;  %v1287_v59 = vmul.f32 %v3038_v28, %v3038_v28 }
 0x3f6   : > { %v3041_v41 = vpop.f32.mrb[26].mxu0 }
 0x3f7   : > { %1659 = vrot.lane.b32.xlu0 %v3024_v36, %s2519_s0  ;;  %v3045_v43 = vpop.f32.mrb[27].mxu0  ;;  %v1290_v56 = vmul.f32 %v3041_v41, %v3041_v41 }
 0x3f8   : > { %1653 = vrot.lane.b32.xlu1 %v3018_v34, %s2519_s0  ;;  %v1289_v57 = vmul.f32 %v3045_v43, %v3045_v43 }
 0x3fa   : > { %v3051_v26 = vpop.f32.mrb[28].mxu0 }
 0x3fb   : > { %1657 = vrot.lane.b32.xlu0 %v3028_v37, %s2519_s0  ;;  %v3055_v48 = vpop.f32.mrb[29].mxu0  ;;  %v1292_v0 = vmul.f32 %v3051_v26, %v3051_v26 }
 0x3fc   : > { %1321 = vrot.lane.b32.xlu1 %v1284_v45, %s2519_s0  ;;  %v1291_v61 = vmul.f32 %v3055_v48, %v3055_v48 }
 0x3fe   : > { %v3062_v51 = vpop.f32.mrb[30].mxu0 }
 0x3ff   : > { %1323 = vrot.lane.b32.xlu0 %v1285_v49, %s2519_s0  ;;  %v3065_v53 = vpop.f32.mrb[31].mxu0  ;;  %v1294_v9 = vmul.f32 %v3062_v51, %v3062_v51 }
 0x400   : > { %1325 = vrot.lane.b32.xlu1 %v1286_v50, %s2519_s0  ;;  %v1293_v4 = vmul.f32 %v3065_v53, %v3065_v53 }
 0x403   : > { %1663 = vrot.lane.b32.xlu0 %v3035_v40, %s2519_s0 }
 0x404   : > { %1329 = vrot.lane.b32.xlu1 %v1288_v55, %s2519_s0 }
 0x407   : > { %1661 = vrot.lane.b32.xlu0 %v3038_v28, %s2519_s0 }
 0x408   : > { %1331 = vrot.lane.b32.xlu1 %v1289_v57, %s2519_s0 }
 0x40b   : > { %1327 = vrot.lane.b32.xlu0 %v1287_v59, %s2519_s0 }
 0x40c   : > { %1335 = vrot.lane.b32.xlu1 %v1291_v61, %s2519_s0 }
 0x40f   : > { %1333 = vrot.lane.b32.xlu0 %v1290_v56, %s2519_s0 }
 0x410   : > { %1339 = vrot.lane.b32.xlu1 %v1293_v4, %s2519_s0 }
 0x413   : > { %1337 = vrot.lane.b32.xlu0 %v1292_v0, %s2519_s0 }
 0x414   : > { %1587 = vrot.lane.b32.xlu1 %v1544_v5, %s2519_s0 }
 0x417   : > { %1341 = vrot.lane.b32.xlu0 %v1294_v9, %s2519_s0 }
 0x418   : > { %1589 = vrot.lane.b32.xlu1 %v1545_v7, %s2519_s0 }
 0x41b   : > { %1665 = vrot.lane.b32.xlu0 %v3045_v43, %s2519_s0 }
 0x41c   : > { %1591 = vrot.lane.b32.xlu1 %v1546_v10, %s2519_s0 }
 0x41f   : > { %1667 = vrot.lane.b32.xlu0 %v3041_v41, %s2519_s0 }
 0x420   : > { %1593 = vrot.lane.b32.xlu1 %v1547_v15, %s2519_s0 }
 0x423   : > { %1669 = vrot.lane.b32.xlu0 %v3055_v48, %s2519_s0 }
 0x424   : > { %1595 = vrot.lane.b32.xlu1 %v1548_v17, %s2519_s0 }
 0x427   : > { %1671 = vrot.lane.b32.xlu0 %v3051_v26, %s2519_s0 }
 0x428   : > { %1675 = vrot.lane.b32.xlu1 %v3062_v51, %s2519_s0 }
 0x42b   : > { %1673 = vrot.lane.b32.xlu0 %v3065_v53, %s2519_s0  ;;  %s1807_s0 = scalar_lea.sflag [#allocation3], %s399_s2 }
 0x455   : > { %v1648_v29 = vpop.permute.xlu0 %1647 }
 0x456   : > { %v1646_v30 = vpop.permute.xlu1 %1645 }
 0x459   : > { %v1312_v42 = vpop.permute.xlu0 %1311 }
 0x45a   : > { %v1359_v44 = vsub.f32 %v3000_v47, %v1312_v42  ;;  %v1314_v18 = vpop.permute.xlu1 %1313 }
 0x45b   : > { %v1360_v24 = vsub.f32 %v2996_v46, %v1314_v18 }
 0x45c   : > { %v1375_v52 = vmax.f32 %v1359_v44, 0.0 }
 0x45d   : > { %v1376_v54 = vmax.f32 %v1360_v24, 0.0  ;;  %v3148_v35 = vpop.permute.xlu0 %1651 }
 0x45e   : > { %2391 = vrsqrt.f32 %v1375_v52  ;;  %v3150_v39 = vpop.permute.xlu1 %1649  ;;  %vm1393_vm4 = vcmp.eq.f32.partialorder %v1375_v52, inf  ;;  %v1396_v4 = vand.u32 2147483648, %v1375_v52  ;;  %vm1395_vm5 = vcmp.eq.f32.partialorder %v1375_v52, 0.0 }
 0x45f   : > { %2393 = vrsqrt.f32 %v1376_v54  ;;  %vm1400_vm6 = vcmp.eq.f32.partialorder %v1376_v54, inf  ;;  %v1403_v6 = vand.u32 2147483648, %v1376_v54  ;;  %vm1402_vm7 = vcmp.eq.f32.partialorder %v1376_v54, 0.0 }
 0x461   : > { %v3152_v22 = vpop.permute.xlu0 %1655 }
 0x462   : > { %v1318_v45 = vpop.permute.xlu1 %1317 }
 0x463   : > { %v1362_v49 = vsub.f32 %v3008_v31, %v1318_v45 }
 0x465   : > { %v1378_v50 = vmax.f32 %v1362_v49, 0.0  ;;  %v1320_v55 = vpop.permute.xlu0 %1319 }
 0x466   : > { %v1363_v47 = vsub.f32 %v3018_v34, %v1320_v55  ;;  %v1316_v57 = vpop.permute.xlu1 %1315 }
 0x467   : > { %2395 = vrsqrt.f32 %v1378_v50  ;;  %v1361_v46 = vsub.f32 %v3011_v58, %v1316_v57  ;;  %vm1414_vm8 = vcmp.eq.f32.partialorder %v1378_v50, inf  ;;  %vm1416_vm10 = vcmp.eq.f32.partialorder %v1378_v50, 0.0 }
 0x468   : > { %v2392_v59 = vpop.eup %2391  ;;  %v3157_v60 = vmax.f32 %v1363_v47, 0.0 }
 0x469   : > { %v2394_v61 = vpop.eup %2393  ;;  %v3159_v1 = vmax.f32 %v1361_v46, 0.0  ;;  %v3161_v56 = vpop.permute.xlu0 %1659  ;;  %v1392_v2 = vmul.f32 %v2392_v59, %v1375_v52 }
 0x46a   : > { %2397 = vrsqrt.f32 %v3157_v60  ;;  %v3164_v31 = vpop.permute.xlu1 %1653  ;;  %v1399_v58 = vmul.f32 %v2394_v61, %v1376_v54  ;;  %vm1421_vm9 = vcmp.eq.f32.partialorder %v3157_v60, inf  ;;  %vm1423_vm12 = vcmp.eq.f32.partialorder %v3157_v60, 0.0 }
 0x46b   : > { %2399 = vrsqrt.f32 %v3159_v1  ;;  %v1394_v34 = vsel %vm1393_vm4, %v1375_v52, %v1392_v2  ;;  %v1424_v52 = vand.u32 2147483648, %v3157_v60  ;;  %vm1407_vm11 = vcmp.eq.f32.partialorder %v3159_v1, inf }
 0x46c   : > { %v1397_v5 = vsel %vm1395_vm5, %v1396_v4, %v1394_v34  ;;  %v1401_v7 = vsel %vm1400_vm6, %v1376_v54, %v1399_v58  ;;  %v1410_v46 = vand.u32 2147483648, %v3159_v1  ;;  %vm1409_vm13 = vcmp.eq.f32.partialorder %v3159_v1, 0.0 }
 0x46d   : > { %v3167_v0 = vpop.permute.xlu0 %1657  ;;  %v1613_v3 = vmul.f32 %v1566_v63, %v1397_v5  ;;  %v1404_v9 = vsel %vm1402_vm7, %v1403_v6, %v1401_v7 }
 0x46e   : > { %v1322_v8 = vpop.permute.xlu1 %1321  ;;  %v1614_v13 = vmul.f32 %v1568_v19, %v1404_v9 }
 0x46f   : > { %v1364_v11 = vsub.f32 %v3014_v32, %v1322_v8  ;;  %v1693_v10 = vadd.f32 %v1646_v30, %v1613_v3  ;;  %v1417_v32 = vand.u32 2147483648, %v1378_v50 }
 0x470   : > { %v1694_v17 = vadd.f32 %v1648_v29, %v1614_v13 }
 0x471   : > { %v2396_v12 = vpop.eup %2395  ;;  %v3170_v15 = vmax.f32 %v1364_v11, 0.0  ;;  %1725 = vrot.lane.b32.xlu0 %v1693_v10, %s2520_s1  ;;  %v1324_v16 = vpop.permute.xlu0 %1323 }
 0x472   : > { %v1365_v42 = vsub.f32 %v3028_v37, %v1324_v16  ;;  %v1326_v44 = vpop.permute.xlu1 %1325  ;;  %v1413_v63 = vmul.f32 %v2396_v12, %v1378_v50  ;;  %1727 = vrot.lane.b32.xlu1 %v1694_v17, %s2520_s1 }
 0x473   : > { %2401 = vrsqrt.f32 %v3170_v15  ;;  %v1366_v18 = vsub.f32 %v3024_v36, %v1326_v44  ;;  %vm1428_vm14 = vcmp.eq.f32.partialorder %v3170_v15, inf  ;;  %vm1430_vm15 = vcmp.eq.f32.partialorder %v3170_v15, 0.0 }
 0x474   : > { %v2398_v19 = vpop.eup %2397  ;;  %v3178_v30 = vmax.f32 %v1365_v42, 0.0  ;;  %v1415_v24 = vsel %vm1414_vm8, %v1378_v50, %v1413_v63 }
 0x475   : > { %v2400_v29 = vpop.eup %2399  ;;  %v1420_v37 = vmul.f32 %v2398_v19, %v3157_v60  ;;  %v3182_v54 = vmax.f32 %v1366_v18, 0.0  ;;  %v3184_v45 = vpop.permute.xlu0 %1663  ;;  %v1418_v36 = vsel %vm1416_vm10, %v1417_v32, %v1415_v24 }
 0x476   : > { %2403 = vrsqrt.f32 %v3178_v30  ;;  %v1330_v49 = vpop.permute.xlu1 %1329  ;;  %v1616_v55 = vmul.f32 %v3138_v33, %v1418_v36  ;;  %v1406_v47 = vmul.f32 %v2400_v29, %v3159_v1  ;;  %vm1435_vm0 = vcmp.eq.f32.partialorder %v3178_v30, inf }
 0x477   : > { %v1422_v50 = vsel %vm1421_vm9, %v3157_v60, %v1420_v37  ;;  %2405 = vrsqrt.f32 %v3182_v54  ;;  %v1368_v57 = vsub.f32 %v3035_v40, %v1330_v49  ;;  %v1438_v17 = vand.u32 2147483648, %v3178_v30 }
 0x478   : > { %v1696_v59 = vadd.f32 %v3148_v35, %v1616_v55  ;;  %v1408_v61 = vsel %vm1407_vm11, %v3159_v1, %v1406_v47  ;;  %v1425_v33 = vsel %vm1423_vm12, %v1424_v52, %v1422_v50  ;;  %vm1437_vm1 = vcmp.eq.f32.partialorder %v3178_v30, 0.0 }
 0x479   : > { %v3198_v2 = vmax.f32 %v1368_v57, 0.0  ;;  %v3200_v4 = vpop.permute.xlu0 %1661  ;;  %v1411_v34 = vsel %vm1409_vm13, %v1410_v46, %v1408_v61  ;;  %v1617_v35 = vmul.f32 %v3130_v21, %v1425_v33  ;;  %vm1442_vm2 = vcmp.eq.f32.partialorder %v3182_v54, inf }
 0x47a   : > { %v1332_v58 = vpop.permute.xlu1 %1331  ;;  %1731 = vrot.lane.b32.xlu1 %v1696_v59, %s2520_s1  ;;  %v1615_v40 = vmul.f32 %v3128_v62, %v1411_v34  ;;  %v1431_v62 = vand.u32 2147483648, %v3170_v15  ;;  %vm1444_vm3 = vcmp.eq.f32.partialorder %v3182_v54, 0.0 }
 0x47b   : > { %2407 = vrsqrt.f32 %v3198_v2  ;;  %v1369_v60 = vsub.f32 %v3045_v43, %v1332_v58  ;;  %vm1456_vm4 = vcmp.eq.f32.partialorder %v3198_v2, inf  ;;  %v1459_v57 = vand.u32 2147483648, %v3198_v2 }
 0x47c   : > { %v1695_v5 = vadd.f32 %v3150_v39, %v1615_v40  ;;  %v1697_v39 = vadd.f32 %v3164_v31, %v1617_v35  ;;  %vm1458_vm6 = vcmp.eq.f32.partialorder %v3198_v2, 0.0 }
 0x47d   : > { %v2402_v1 = vpop.eup %2401  ;;  %v3208_v6 = vmax.f32 %v1369_v60, 0.0  ;;  %v1328_v3 = vpop.permute.xlu0 %1327 }
 0x47e   : > { %v1367_v7 = vsub.f32 %v3038_v28, %v1328_v3  ;;  %v1336_v8 = vpop.permute.xlu1 %1335  ;;  %1729 = vrot.lane.b32.xlu0 %v1695_v5, %s2520_s1  ;;  %v1427_v9 = vmul.f32 %v2402_v1, %v3170_v15 }
 0x47f   : > { %2409 = vrsqrt.f32 %v3208_v6  ;;  %v1371_v43 = vsub.f32 %v3055_v48, %v1336_v8  ;;  %vm1463_vm5 = vcmp.eq.f32.partialorder %v3208_v6, inf  ;;  %vm1465_vm7 = vcmp.eq.f32.partialorder %v3208_v6, 0.0 }
 0x480   : > { %v2404_v21 = vpop.eup %2403  ;;  %v3219_v11 = vmax.f32 %v1367_v7, 0.0  ;;  %v1429_v28 = vsel %vm1428_vm14, %v3170_v15, %v1427_v9 }
 0x481   : > { %v2406_v10 = vpop.eup %2405  ;;  %v3223_v13 = vmax.f32 %v1371_v43, 0.0  ;;  %v1334_v12 = vpop.permute.xlu0 %1333  ;;  %v1432_v16 = vsel %vm1430_vm15, %v1431_v62, %v1429_v28  ;;  %v1434_v48 = vmul.f32 %v2404_v21, %v3178_v30 }
 0x482   : > { %2411 = vrsqrt.f32 %v3219_v11  ;;  %v1370_v42 = vsub.f32 %v3041_v41, %v1334_v12  ;;  %v1340_v31 = vpop.permute.xlu1 %1339  ;;  %1733 = vrot.lane.b32.xlu0 %v1697_v39, %s2520_s1  ;;  %v1618_v15 = vmul.f32 %v3142_v38, %v1432_v16  ;;  %v1441_v44 = vmul.f32 %v2406_v10, %v3182_v54 }
 0x483   : > { %2413 = vrsqrt.f32 %v3223_v13  ;;  %v1373_v63 = vsub.f32 %v3065_v53, %v1340_v31  ;;  %v1436_v18 = vsel %vm1435_vm0, %v3178_v30, %v1434_v48  ;;  %v1445_v53 = vand.u32 2147483648, %v3182_v54 }
 0x484   : > { %v3236_v32 = vmax.f32 %v1370_v42, 0.0  ;;  %v1698_v19 = vadd.f32 %v3152_v22, %v1618_v15  ;;  %v1439_v41 = vsel %vm1437_vm1, %v1438_v17, %v1436_v18  ;;  %v1443_v52 = vsel %vm1442_vm2, %v3182_v54, %v1441_v44 }
 0x485   : > { %v2408_v24 = vpop.eup %2407  ;;  %v3240_v29 = vmax.f32 %v1373_v63, 0.0  ;;  %v1338_v38 = vpop.permute.xlu0 %1337  ;;  %v1619_v37 = vmul.f32 %v3132_v27, %v1439_v41  ;;  %v1446_v49 = vsel %vm1444_vm3, %v1445_v53, %v1443_v52  ;;  %vm1449_vm8 = vcmp.eq.f32.partialorder %v3219_v11, inf }
 0x486   : > { %2415 = vrsqrt.f32 %v3236_v32  ;;  %v1372_v30 = vsub.f32 %v3051_v26, %v1338_v38  ;;  %v3247_v36 = vpop.permute.xlu1 %1587  ;;  %1735 = vrot.lane.b32.xlu1 %v1698_v19, %s2520_s1  ;;  %v1620_v55 = vmul.f32 %v3134_v14, %v1446_v49  ;;  %v1455_v47 = vmul.f32 %v2408_v24, %v3198_v2 }
 0x487   : > { %2417 = vrsqrt.f32 %v3240_v29  ;;  %v1699_v22 = vadd.f32 %v3167_v0, %v1619_v37  ;;  %v1466_v14 = vand.u32 2147483648, %v3208_v6  ;;  %v1452_v7 = vand.u32 2147483648, %v3219_v11 }
 0x488   : > { %v3253_v27 = vmax.f32 %v1372_v30, 0.0  ;;  %v1700_v46 = vadd.f32 %v3161_v56, %v1620_v55  ;;  %v1457_v61 = vsel %vm1456_vm4, %v3198_v2, %v1455_v47  ;;  %vm1451_vm9 = vcmp.eq.f32.partialorder %v3219_v11, 0.0 }
 0x489   : > { %v2410_v50 = vpop.eup %2409  ;;  %1737 = vrot.lane.b32.xlu0 %v1699_v22, %s2520_s1  ;;  %v1342_v26 = vpop.permute.xlu0 %1341  ;;  %v1460_v56 = vsel %vm1458_vm6, %v1459_v57, %v1457_v61  ;;  %vm1477_vm10 = vcmp.eq.f32.partialorder %v3223_v13, inf  ;;  %vm1470_vm11 = vcmp.eq.f32.partialorder %v3236_v32, inf  ;;  %vm1472_vm12 = vcmp.eq.f32.partialorder %v3236_v32, 0.0 }
 0x48a   : > { %2419 = vrsqrt.f32 %v3253_v27  ;;  %v1374_v54 = vsub.f32 %v3062_v51, %v1342_v26  ;;  %v1590_v0 = vpop.permute.xlu1 %1589  ;;  %v1462_v59 = vmul.f32 %v2410_v50, %v3208_v6  ;;  %1739 = vrot.lane.b32.xlu1 %v1700_v46, %s2520_s1  ;;  %v1622_v35 = vmul.f32 %v3140_v23, %v1460_v56 }
 0x48b   : > { %v1480_v12 = vand.u32 2147483648, %v3223_v13  ;;  %vm1479_vm13 = vcmp.eq.f32.partialorder %v3223_v13, 0.0  ;;  %vm1491_vm14 = vcmp.eq.f32.partialorder %v3240_v29, inf  ;;  %vm1484_vm15 = vcmp.eq.f32.partialorder %v3253_v27, inf }
 0x48c   : > { %v2412_v33 = vpop.eup %2411  ;;  %v3268_v34 = vmax.f32 %v1374_v54, 0.0  ;;  %v1464_v51 = vsel %vm1463_vm5, %v3208_v6, %v1462_v59  ;;  %v1702_v6 = vadd.f32 %v3184_v45, %v1622_v35  ;;  %v1473_v45 = vand.u32 2147483648, %v3236_v32 }
 0x48d   : > { %v2414_v58 = vpop.eup %2413  ;;  %v1467_v40 = vsel %vm1465_vm7, %v1466_v14, %v1464_v51  ;;  %v1666_v60 = vpop.permute.xlu0 %1665  ;;  %v1448_v5 = vmul.f32 %v2412_v33, %v3219_v11  ;;  %v1487_v44 = vand.u32 2147483648, %v3253_v27  ;;  %v1494_v63 = vand.u32 2147483648, %v3240_v29 }
 0x48e   : > { %2421 = vrsqrt.f32 %v3268_v34  ;;  %v1476_v2 = vmul.f32 %v2414_v58, %v3223_v13  ;;  %v1623_v1 = vmul.f32 %v3144_v25, %v1467_v40  ;;  %v1592_v3 = vpop.permute.xlu1 %1591  ;;  %1743 = vrot.lane.b32.xlu1 %v1702_v6, %s2520_s1  ;;  %vm1486_vm0 = vcmp.eq.f32.partialorder %v3253_v27, 0.0 }
 0x48f   : > { %v1450_v8 = vsel %vm1449_vm8, %v3219_v11, %v1448_v5  ;;  %vm1493_vm1 = vcmp.eq.f32.partialorder %v3240_v29, 0.0  ;;  %vm1498_vm2 = vcmp.eq.f32.partialorder %v3268_v34, inf  ;;  %vm1500_vm3 = vcmp.eq.f32.partialorder %v3268_v34, 0.0 }
 0x490   : > { %v2416_v23 = vpop.eup %2415  ;;  %v1453_v9 = vsel %vm1451_vm9, %v1452_v7, %v1450_v8  ;;  %v1478_v39 = vsel %vm1477_vm10, %v3223_v13, %v1476_v2  ;;  %v1703_v18 = vadd.f32 %v1666_v60, %v1623_v1 }
 0x491   : > { %v2418_v43 = vpop.eup %2417  ;;  %v1469_v62 = vmul.f32 %v2416_v23, %v3236_v32  ;;  %v1668_v21 = vpop.permute.xlu0 %1667  ;;  %v1621_v25 = vmul.f32 %v3136_v20, %v1453_v9  ;;  %v1481_v42 = vsel %vm1479_vm13, %v1480_v12, %v1478_v39 }
 0x492   : > { %v1490_v11 = vmul.f32 %v2418_v43, %v3240_v29  ;;  %v1594_v28 = vpop.permute.xlu1 %1593  ;;  %v1625_v41 = vmul.f32 %v1590_v0, %v1481_v42 }
 0x493   : > { %v1471_v10 = vsel %vm1470_vm11, %v3236_v32, %v1469_v62  ;;  %v1701_v16 = vadd.f32 %v3200_v4, %v1621_v25 }
 0x494   : > { %v2420_v48 = vpop.eup %2419  ;;  %v1474_v17 = vsel %vm1472_vm12, %v1473_v45, %v1471_v10  ;;  %v1492_v4 = vsel %vm1491_vm14, %v3240_v29, %v1490_v11 }
 0x495   : > { %v1624_v20 = vmul.f32 %v3247_v36, %v1474_v17  ;;  %v1483_v31 = vmul.f32 %v2420_v48, %v3253_v27  ;;  %1741 = vrot.lane.b32.xlu0 %v1701_v16, %s2520_s1  ;;  %v1670_v15 = vpop.permute.xlu0 %1669  ;;  %v1495_v52 = vsel %vm1493_vm1, %v1494_v63, %v1492_v4  ;;  %v1501_v36 = vand.u32 2147483648, %v3268_v34 }
 0x496   : > { %v1596_v38 = vpop.permute.xlu1 %1595  ;;  %v1705_v22 = vadd.f32 %v1670_v15, %v1625_v41 }
 0x497   : > { %v1485_v13 = vsel %vm1484_vm15, %v3253_v27, %v1483_v31  ;;  %v1704_v32 = vadd.f32 %v1668_v21, %v1624_v20  ;;  %v1627_v27 = vmul.f32 %v1594_v28, %v1495_v52 }
 0x498   : > { %v2422_v19 = vpop.eup %2421  ;;  %v1488_v24 = vsel %vm1486_vm0, %v1487_v44, %v1485_v13 }
 0x499   : > { %v1626_v37 = vmul.f32 %v1592_v3, %v1488_v24  ;;  %v1497_v53 = vmul.f32 %v2422_v19, %v3268_v34  ;;  %1745 = vrot.lane.b32.xlu0 %v1703_v18, %s2520_s1  ;;  %1747 = vrot.lane.b32.xlu1 %v1704_v32, %s2520_s1  ;;  %v1672_v30 = vpop.permute.xlu0 %1671 }
 0x49a   : > { %v1676_v26 = vpop.permute.xlu1 %1675 }
 0x49b   : > { %v1499_v49 = vsel %vm1498_vm2, %v3268_v34, %v1497_v53  ;;  %v1706_v29 = vadd.f32 %v1672_v30, %v1626_v37 }
 0x49c   : > { %v1502_v55 = vsel %vm1500_vm3, %v1501_v36, %v1499_v49 }
 0x49d   : > { %v1628_v47 = vmul.f32 %v1596_v38, %v1502_v55  ;;  %1749 = vrot.lane.b32.xlu0 %v1705_v22, %s2520_s1  ;;  %1751 = vrot.lane.b32.xlu1 %v1706_v29, %s2520_s1  ;;  %v1674_v50 = vpop.permute.xlu0 %1673 }
 0x49e   : > { %v1707_v57 = vadd.f32 %v1674_v50, %v1627_v27 }
 0x49f   : > { %v1708_v54 = vadd.f32 %v1676_v26, %v1628_v47 }
 0x4a1   : > { %1755 = vrot.lane.b32.xlu1 %v1708_v54, %s2520_s1  ;;  %1753 = vrot.lane.b32.xlu0 %v1707_v57, %s2520_s1  ;;  %s2423_s1 = scalar_lea.vmem %s3321_s22, 64 }
 0x4a2   : > { %p2424_p0 = scmp.ne.s32.totalorder %s3321_s22, %s2423_s1  ;;  %p2431_p5 = scmp.lt.s32.totalorder %s2429_s13, %s2423_s1 }
 0x4a4   : > { %p2425_p1 = pnand %p2424_p0, %p2618_p3  ;;  %p2432_p6 = por %p2431_p5, %p2430_p4 }
 0x4a6   : > { %p2426_p2 = pneg %p2425_p1 }
 0x4a8   : > { %p2433_p7 = pnand %p2432_p6, %p2426_p2 }
 0x4e3   : > { %v1726_v0 = vpop.permute.xlu0 %1725 }
 0x4e4   : > { %1773 = vxpose.xlu0.b32.start [1/16] (narrow) %v1726_v0, 8  ;;  %v1728_v46 = vpop.permute.xlu1 %1727 }
 0x4e8   : > { %1774 = vxpose.xlu0.b32.cont [2/16] (narrow) %v1728_v46, 8 }
 0x4ec   : > { %v1732_v14 = vpop.permute.xlu1 %1731 }
 0x4f0   : > { %v1730_v59 = vpop.permute.xlu0 %1729 }
 0x4f1   : > { %1775 = vxpose.xlu0.b32.cont [3/16] (narrow) %v1730_v59, 8 }
 0x4f4   : > { %v1734_v61 = vpop.permute.xlu0 %1733 }
 0x4f5   : > { %1776 = vxpose.xlu0.b32.cont [4/16] (narrow) %v1732_v14, 8 }
 0x4f8   : > { %v1736_v33 = vpop.permute.xlu1 %1735 }
 0x4f9   : > { %1777 = vxpose.xlu0.b32.cont [5/16] (narrow) %v1734_v61, 8 }
 0x4fb   : > { %v1738_v34 = vpop.permute.xlu0 %1737 }
 0x4fc   : > { %v1740_v51 = vpop.permute.xlu1 %1739 }
 0x4fd   : > { %1778 = vxpose.xlu0.b32.cont [6/16] (narrow) %v1736_v33, 8 }
 0x500   : > { %v1744_v58 = vpop.permute.xlu1 %1743 }
 0x501   : > { %1779 = vxpose.xlu0.b32.cont [7/16] (narrow) %v1738_v34, 8 }
 0x505   : > { %1780 = vxpose.xlu0.b32.cont [8/16] (narrow) %v1740_v51, 8 }
 0x507   : > { %v1742_v56 = vpop.permute.xlu0 %1741 }
 0x509   : > { %1781 = vxpose.xlu0.b32.cont [9/16] (narrow) %v1742_v56, 8 }
 0x50b   : > { %v1746_v40 = vpop.permute.xlu0 %1745  ;;  %v1748_v60 = vpop.permute.xlu1 %1747 }
 0x50d   : > { %1782 = vxpose.xlu0.b32.cont [10/16] (narrow) %v1744_v58, 8 }
 0x50f   : > { %v1750_v35 = vpop.permute.xlu0 %1749  ;;  %v1752_v5 = vpop.permute.xlu1 %1751 }
 0x511   : > { %1783 = vxpose.xlu0.b32.cont [11/16] (narrow) %v1746_v40, 8 }
 0x513   : > { %v1754_v2 = vpop.permute.xlu0 %1753  ;;  %v1756_v1 = vpop.permute.xlu1 %1755 }
 0x515   : > { %1784 = vxpose.xlu0.b32.cont [12/16] (narrow) %v1748_v60, 8 }
 0x519   : > { %1785 = vxpose.xlu0.b32.cont [13/16] (narrow) %v1750_v35, 8 }
 0x51d   : > { %1786 = vxpose.xlu0.b32.cont [14/16] (narrow) %v1752_v5, 8 }
 0x521   : > { %1787 = vxpose.xlu0.b32.cont [15/16] (narrow) %v1754_v2, 8 }
 0x525   : > { %1788 = vxpose.xlu0.b32.end [16/16] (narrow) %v1756_v1, 8 }
 0x569   : > { %v1789_v3 = vpop.trf.xlu0 }
 0x56a   : > { %1805 = vst [vmem:[%s401_s17] sm:$0xf] %v1789_v3 }
 0x56b   : > { %2436 = shalt.err (!%p2433_p7)
}
 0x56c   : > { %s2437_s2 = scalar_lea.hbm %s3326_s21, 64  ;;  %s2441_s17 = scalar_lea.hbm %s3385_s8, 256 }
 0x56d   : > { %p2438_p9 = scmp.ne.s32.totalorder %s3326_s21, %s2437_s2  ;;  %p2442_p12 = scmp.lt.u32.totalorder %s3326_s21, %s3385_s8 }
 0x56e   : > { %p2443_p13 = scmp.lt.u32.totalorder %s2441_s17, %s2437_s2  ;;  %p2445_p1 = scmp.lt.u32.totalorder %s2437_s2, %s3326_s21 }
 0x56f   : > { %p2439_p10 = pnand %p2438_p9, %p2618_p3 }
 0x570   : > { %p2444_p0 = por %p2443_p13, %p2442_p12 }
 0x571   : > { %p2440_p11 = pneg %p2439_p10 }
 0x572   : > { %p2446_p2 = por %p2445_p1, %p2444_p0 }
 0x574   : > { %p2447_p4 = pnand %p2446_p2, %p2440_p11 }
 0x576   : > { %2450 = shalt.err (!%p2447_p4)
}
 0x577   : > { %2254 = dma.vmem_to_hbm [thread:$0]  (%p2618_p3), %s3321_s22, 64, %s3326_s21, %s1807_s0  }
 0x578 PF: > { %p2260_p5 = scmp.ge.s32.totalorder %s2517_s12, 2  ;;  %s1834_s14 = sand.u32 1, %s2489_s27  }
 0x579   : > { %s1835_s1 = scalar_lea.sflag [#allocation3], %s1834_s14 }
 0x57a   : > { %p2257_p6 = pnand %p2260_p5, %p2627_p8 }
 0x57c   : > { %2484 = dma.done.wait (!%p2257_p6), %s1835_s1, 64  }
 0x57d   : > { %2486 = vsyncadd (!%p2257_p6), %s1835_s1, 4294967232  ;;  %s21_s12 = sadd.s32 1, %s2517_s12   ;;  %s3396_s27 = smov %s2493_s28 }
 0x57e   : > { %p18_p7 = scmp.ge.s32.totalorder %s21_s12, 6   ;;  %s3397_s28 = smov %s2497_s29 }
 0x57f   : > { %s3398_s29 = smov %s2636_s23  ;;  %s3399_s30 = smov %s2509_s10 }
 0x580   : > { %s3400_s9 = smov %s2513_s11  ;;  %s3401_s10 = smov %s3404_s15 }
 0x581   : > { %s3402_s11 = smov %s3408_s16  ;;  %20 = sbr.rel (!%p18_p7) target bundleno = 9 (0x9), region = 102 }
 0x588   :  { %1840 = vsyncpa [#allocation3], 1 }
 0x589   :  { %1842 = vsyncpa [#allocation3 + $0x1], 1 }

</bundles_post_ra>
